<compile_context>
chip_gen: v7x
topology: tpu7x:2x2x1
jax: 0.10.0
libtpu: 0.0.40
codegen_flags: <defaults>
</compile_context>

<pallas_src>
import functools

import numpy as np

import jax
import jax.numpy as jnp
from jax.experimental import pallas as pl
from jax.experimental.pallas import tpu as pltpu

EPS = 1e-5


# ----------------------------------------------------------------------------
# Host-side matrix builders (static, tiny)
# ----------------------------------------------------------------------------
def _bilinear_up2_matrix(n_in):
    """(2*n_in, n_in) matrix of nn.Upsample(scale_factor=2, bilinear, align_corners=True)."""
    n_out = 2 * n_in
    U = np.zeros((n_out, n_in), np.float64)
    if n_in == 1:
        U[:, 0] = 1.0
        return U.astype(np.float32)
    for d in range(n_out):
        s = d * (n_in - 1) / (n_out - 1)
        i0 = min(int(np.floor(s)), n_in - 1)
        i1 = min(i0 + 1, n_in - 1)
        f = s - i0
        U[d, i0] += 1.0 - f
        U[d, i1] += f
    return U.astype(np.float32)


def _conv3x3_fused_matrix(w_oihw, scale, W, G):
    """Fused banded weight (3*G*W*Cin, G*W*Cout) such that, in the lane-packed
    (h, g*W*C + w*C + c) layout:
        concat([x[h-1], x[h], x[h+1]], lanes) @ M == (conv3x3(x, pad=1) * scale)[h]
    W zero-padding and the folded BN scale are baked into M; the G batch items
    packed into lanes are handled block-diagonally (kron with eye(G))."""
    w = np.asarray(w_oihw, np.float64) * np.asarray(scale, np.float64)[:, None, None, None]
    Cout, Cin, KH, KW = w.shape
    blocks = []
    for di in range(KH):
        M = np.zeros((W * Cin, W * Cout), np.float64)
        for dj in range(KW):
            tap = w[:, :, di, dj].T                      # (Cin, Cout)
            for wo in range(W):
                wi = wo + dj - 1
                if 0 <= wi < W:
                    M[wi * Cin:(wi + 1) * Cin, wo * Cout:(wo + 1) * Cout] += tap
        blocks.append(np.kron(np.eye(G), M))             # (G*W*Cin, G*W*Cout)
    return np.concatenate(blocks, axis=0).astype(np.float32)


def _upsample_col_matrix(U, C, G):
    """Column (lane) upsample matrix for the (g, w, c) lane layout."""
    return np.kron(np.eye(G), np.kron(U.T, np.eye(C))).astype(np.float32)


def _row_compaction(h_in, factor):
    """(h_in//factor, h_in) selection of every `factor`-th row (pool compaction)."""
    S = np.zeros((h_in // factor, h_in), np.float32)
    for i in range(h_in // factor):
        S[i, factor * i] = 1.0
    return S


def _col_pool_selectors(W, C, G, factor):
    """(factor, G*W*C, G*(W//factor)*C) selection matrices for W max-pooling in the
    channel-interleaved lane layout (g, w, c):  out = max_k (x @ S[k])."""
    L_in, L_out = G * W * C, G * (W // factor) * C
    S = np.zeros((factor, L_in, L_out), np.float32)
    for k in range(factor):
        for g in range(G):
            for j in range(W // factor):
                for c in range(C):
                    S[k, g * W * C + (factor * j + k) * C + c,
                      g * (W // factor) * C + j * C + c] = 1.0
    return S


# ----------------------------------------------------------------------------
# Parameter construction (BasicConv2d = Conv2d(bias=False) + BN(eval) + ReLU)
# ----------------------------------------------------------------------------
def _init_basic_conv(key, cin, cout):
    ks = jax.random.split(key, 5)
    w = 0.2 * jax.random.normal(ks[0], (cout, cin, 3, 3), jnp.float32)
    gamma = 1.0 + 0.1 * jax.random.normal(ks[1], (cout,), jnp.float32)
    beta = 0.1 * jax.random.normal(ks[2], (cout,), jnp.float32)
    mean = 0.1 * jax.random.normal(ks[3], (cout,), jnp.float32)
    var = 0.5 + jax.random.uniform(ks[4], (cout,), jnp.float32)
    scale = gamma / jnp.sqrt(var + EPS)          # folded BN (inference semantics)
    bias = beta - mean * scale
    return w, scale, bias


def init_aggregation_params(key, C, H, W, G):
    """G = number of batch items packed into the lane dim per kernel step.
    Returns (kernel_params, raw_params); kernel_params contains ONLY arrays."""
    assert H == W and H % 4 == 0, "square spatial, divisible by 4 assumed"
    ks = jax.random.split(key, 6)
    convs = {}
    for name, k in zip(("up1", "up2", "ms1", "ms2", "c4"), ks[:5]):
        convs[name] = _init_basic_conv(k, C, C)

    k5w, k5b = jax.random.split(ks[5])
    w5 = 0.2 * jax.random.normal(k5w, (1, C, 1, 1), jnp.float32)    # conv5 (bias=True)
    b5 = 0.1 * jax.random.normal(k5b, (1,), jnp.float32)

    # bilinear interpolation matrices (align_corners=True, scale 2)
    U_lo = _bilinear_up2_matrix(H // 4)                 # (H/2, H/4)
    U_hi = _bilinear_up2_matrix(H // 2)                 # (H,   H/2)
    UH1 = (U_hi @ U_lo).astype(np.float32)              # combined 4x upsample (H, H/4)
    UH2 = U_hi                                          # (H, H/2)

    L = G * W * C
    wmats, brows = [], []
    for name in ("up1", "up2", "ms1", "ms2", "c4"):
        w, scale, bias = convs[name]
        wmats.append(_conv3x3_fused_matrix(np.asarray(w), np.asarray(scale), W, G))
        brows.append(np.tile(np.asarray(bias, np.float32), G * W).reshape(1, L))
    wconv = np.stack(wmats, axis=0)                     # (5, 3L, L) fused banded weights
    bconv = np.stack(brows, axis=0)                     # (5, 1, L)

    # conv5 (1x1, C->1, bias) as an (L, G*W) matrix in the packed layout
    w5_vec = np.asarray(w5, np.float32)[0, :, 0, 0].reshape(C, 1)
    M5 = np.kron(np.eye(G * W, dtype=np.float32), w5_vec).astype(np.float32)

    # boundary masks for the rolled (wrapped) rows of the 3x3 conv
    mtop = np.ones((H, 1), np.float32); mtop[0, 0] = 0.0
    mbot = np.ones((H, 1), np.float32); mbot[H - 1, 0] = 0.0

    params = dict(
        uh1=jnp.asarray(UH1),
        mw1=jnp.asarray(_upsample_col_matrix(UH1, C, G)),
        uh2=jnp.asarray(UH2),
        mw2=jnp.asarray(_upsample_col_matrix(UH2, C, G)),
        wconv=jnp.asarray(wconv), bconv=jnp.asarray(bconv),
        w5=jnp.asarray(M5), b5=jnp.asarray(b5).reshape(1, 1),
        selr2=jnp.asarray(_row_compaction(H, 2)),
        selr4=jnp.asarray(_row_compaction(H, 4)),
        sgc=jnp.asarray(_col_pool_selectors(W, C, G, 2)),
        sx=jnp.asarray(_col_pool_selectors(W, 1, G, 4)),
        mtop=jnp.asarray(mtop), mbot=jnp.asarray(mbot),
    )
    raw = dict(convs=convs, w5=w5, b5=b5,
               U_lo=jnp.asarray(U_lo), U_hi=jnp.asarray(U_hi))
    return params, raw


# ----------------------------------------------------------------------------
# The fused Pallas kernel
# ----------------------------------------------------------------------------
def make_aggregation_kernel(H, W, C, G):
    L = G * W * C            # activation lane width
    LW = G * W               # conv5-output lane width
    fuse = (L % 128 == 0)    # fused K=3L conv matmul only when lane pieces are tile-aligned

    def _mm(a, b):
        return jnp.dot(a, b, preferred_element_type=jnp.float32)

    def kernel(x1_ref, x2_ref, x3_ref,
               uh1_ref, mw1_ref, uh2_ref, mw2_ref,
               wconv_ref, bconv_ref, w5_ref, b5_ref,
               selr2_ref, selr4_ref, sgc_ref, sx_ref,
               mtop_ref, mbot_ref,
               out_ref, gc_ref):
        mtop = mtop_ref[...]            # (H, 1): 0 on row 0
        mbot = mbot_ref[...]            # (H, 1): 0 on row H-1

        def conv3x3_relu(x2d, k):
            # BasicConv2d: +/-1 row shift = XLU sublane roll + boundary mask;
            # all 9 taps + W padding + BN live in one banded matrix -> ONE matmul.
            xm = pltpu.roll(x2d, 1, 0) * mtop        # x[h-1] (zero at top)
            xp = pltpu.roll(x2d, H - 1, 0) * mbot    # x[h+1] (zero at bottom)
            wk = wconv_ref[k]                        # (3L, L)
            if fuse:
                y = _mm(jnp.concatenate([xm, x2d, xp], axis=1), wk)       # K = 3L
            else:
                y = (_mm(xm, wk[0:L]) + _mm(x2d, wk[L:2 * L])
                     + _mm(xp, wk[2 * L:3 * L]))
            return jnp.maximum(y + bconv_ref[k], 0.0)

        x1 = x1_ref[0]                   # (H/4, G*(W/4)*C)
        x2 = x2_ref[0]                   # (H/2, G*(W/2)*C)
        x3 = x3_ref[0]                   # (H,   L)

        # bilinear upsample (scale 2, align_corners=True) as separable matmuls
        u1 = _mm(_mm(uh1_ref[...], x1), mw1_ref[...])      # (H, L) 4x upsample of x1
        u2 = _mm(_mm(uh2_ref[...], x2), mw2_ref[...])      # (H, L) 2x upsample of x2

        x1c = conv3x3_relu(u1, 0)                  # conv_upsample1
        x2c = conv3x3_relu(u2, 1)                  # conv_upsample2
        t31 = conv3x3_relu(x3 - x1c, 2)            # conv_ms1(x3 - x1)
        t21 = conv3x3_relu(x2c - x1c, 3)           # conv_ms2(x2 - x1)
        x4 = conv3x3_relu(t31 + t21 + x1c, 4)      # conv4 -> gc_channel (pre-pool)

        # conv5: 1x1 conv C->1 with bias -> (H, LW)
        x5 = _mm(x4, w5_ref[...]) + b5_ref[...]

        # x = pool(pool(conv5(x))) == max over 4x4 blocks:
        # rows via XLU rolls + max + one compaction matmul, cols via precomputed
        # selection matmuls (no in-kernel iota / div / mod).
        rmax = jnp.maximum(jnp.maximum(x5, pltpu.roll(x5, H - 1, 0)),
                           jnp.maximum(pltpu.roll(x5, H - 2, 0),
                                       pltpu.roll(x5, H - 3, 0)))
        rrows = _mm(selr4_ref[...], rmax)                              # (H/4, LW)
        xc = jnp.maximum(jnp.maximum(_mm(rrows, sx_ref[0]), _mm(rrows, sx_ref[1])),
                         jnp.maximum(_mm(rrows, sx_ref[2]), _mm(rrows, sx_ref[3])))
        out_ref[0] = xc                                                # (H/4, LW/4)

        # gc_channel = pool(conv4(x))  (2x2 max, channel-interleaved lanes)
        gmax = jnp.maximum(x4, pltpu.roll(x4, H - 1, 0))
        grows = _mm(selr2_ref[...], gmax)                              # (H/2, L)
        gc_ref[0] = jnp.maximum(_mm(grows, sgc_ref[0]), _mm(grows, sgc_ref[1]))

    return kernel


# ----------------------------------------------------------------------------
# Wrapper (PyTorch NCHW at the boundary)
# ----------------------------------------------------------------------------
def _pick_group(N):
    """Batch items packed into lanes per kernel step.  v7x has 2 TensorCores, so keep
    grid=(N,) there ('parallel' splits the batch across cores); single-TC v5e/v6e
    pack the whole batch into lanes (128-lane vregs, single grid step)."""
    try:
        kind = jax.devices()[0].device_kind.lower()
    except Exception:
        kind = ""
    if ("v7" in kind or "7x" in kind) and N > 1:
        return 1
    return N


def _pack_lanes(x, G):
    """NCHW -> (N/G, H, G*W*C) with lane layout (g, w, c)."""
    n, c, h, w = x.shape
    x = x.reshape(n // G, G, c, h, w)
    x = jnp.transpose(x, (0, 3, 1, 4, 2))      # (N/G, H, G, W, C)
    return x.reshape(n // G, h, G * w * c)


def aggregation_forward(x1, x2, x3, params, *, group):
    """x1:(N,C,H/4,W/4), x2:(N,C,H/2,W/2), x3:(N,C,H,W) NCHW.
    Returns (x, gc_channel) NCHW: (N,1,H/4,W/4), (N,C,H/2,W/2)."""
    N, C, H, W = x3.shape
    G = group
    steps = N // G
    L = G * W * C
    LW = G * W

    x1p, x2p, x3p = _pack_lanes(x1, G), _pack_lanes(x2, G), _pack_lanes(x3, G)
    kernel = make_aggregation_kernel(H, W, C, G)

    def act_spec(arr):
        return pl.BlockSpec((1,) + arr.shape[1:], lambda n: (n, 0, 0))

    def par_spec(arr):
        nd = arr.ndim
        return pl.BlockSpec(arr.shape, lambda n, _nd=nd: (0,) * _nd)

    pnames = ("uh1", "mw1", "uh2", "mw2", "wconv", "bconv", "w5", "b5",
              "selr2", "selr4", "sgc", "sx", "mtop", "mbot")
    pvals = [params[k] for k in pnames]

    out_x2d, gc2d = pl.pallas_call(
        kernel,
        out_shape=(
            jax.ShapeDtypeStruct((steps, H // 4, LW // 4), jnp.float32),
            jax.ShapeDtypeStruct((steps, H // 2, L // 2), jnp.float32),
        ),
        grid=(steps,),
        in_specs=[act_spec(x1p), act_spec(x2p), act_spec(x3p)]
                 + [par_spec(v) for v in pvals],
        out_specs=(
            pl.BlockSpec((1, H // 4, LW // 4), lambda n: (n, 0, 0)),
            pl.BlockSpec((1, H // 2, L // 2), lambda n: (n, 0, 0)),
        ),
        compiler_params=pltpu.CompilerParams(
            dimension_semantics=("parallel",)),   # splits batch across TCs on v7x
    )(x1p, x2p, x3p, *pvals)

    # unpack lane-packed outputs back to NCHW (free boundary glue)
    out_x = out_x2d.reshape(steps, H // 4, G, W // 4)
    out_x = jnp.transpose(out_x, (0, 2, 1, 3)).reshape(N, 1, H // 4, W // 4)
    gc = gc2d.reshape(steps, H // 2, G, W // 2, C)
    gc = jnp.transpose(gc, (0, 2, 4, 1, 3)).reshape(N, C, H // 2, W // 2)
    return out_x, gc


# ----------------------------------------------------------------------------
# Pure-JAX (XLA) reference of the PyTorch forward, for a correctness check
# ----------------------------------------------------------------------------
def reference_forward(x1, x2, x3, raw):
    hp = jax.lax.Precision.HIGHEST

    def up(x, U):
        x = jnp.einsum('oh,nchw->ncow', U, x, precision=hp)
        x = jnp.einsum('pw,ncow->ncop', U, x, precision=hp)
        return x

    def basic_conv(x, p):
        w, scale, bias = p
        y = jax.lax.conv_general_dilated(
            x, w, window_strides=(1, 1), padding=((1, 1), (1, 1)),
            dimension_numbers=('NCHW', 'OIHW', 'NCHW'), precision=hp)
        y = y * scale[None, :, None, None] + bias[None, :, None, None]
        return jnp.maximum(y, 0.0)

    def pool(x):
        return jax.lax.reduce_window(x, -jnp.inf, jax.lax.max,
                                     (1, 1, 2, 2), (1, 1, 2, 2), 'VALID')

    convs = raw['convs']
    x1u = basic_conv(up(up(x1, raw['U_lo']), raw['U_hi']), convs['up1'])
    x2u = basic_conv(up(x2, raw['U_hi']), convs['up2'])
    x3_x1 = basic_conv(x3 - x1u, convs['ms1'])
    x2_x1 = basic_conv(x2u - x1u, convs['ms2'])
    xx = basic_conv(x3_x1 + x2_x1 + x1u, convs['c4'])
    gc = pool(xx)
    y = jax.lax.conv_general_dilated(
        xx, raw['w5'], window_strides=(1, 1), padding=((0, 0), (0, 0)),
        dimension_numbers=('NCHW', 'OIHW', 'NCHW'), precision=hp)
    y = y + raw['b5'][None, :, None, None]
    y = pool(pool(y))
    return y, gc


# ----------------------------------------------------------------------------
# Main
# ----------------------------------------------------------------------------
if __name__ == "__main__":
    N, C = 2, 4
    H, W = 16, 16            # x3 resolution; x2 is H/2, x1 is H/4

    key = jax.random.PRNGKey(0)
    kx1, kx2, kx3, kp = jax.random.split(key, 4)
    x1 = jax.random.normal(kx1, (N, C, H // 4, W // 4), jnp.float32)
    x2 = jax.random.normal(kx2, (N, C, H // 2, W // 2), jnp.float32)
    x3 = jax.random.normal(kx3, (N, C, H, W), jnp.float32)

    G = _pick_group(N)                       # 2 on v5e/v6e (pack batch), 1 on v7x
    params, raw = init_aggregation_params(kp, C, H, W, G)

    fwd = jax.jit(functools.partial(aggregation_forward, group=G))
    out_x, gc = fwd(x1, x2, x3, params)
    jax.block_until_ready((out_x, gc))

    assert out_x.shape == (N, 1, H // 4, W // 4)
    assert gc.shape == (N, C, H // 2, W // 2)
    assert bool(jnp.all(jnp.isfinite(out_x))) and bool(jnp.all(jnp.isfinite(gc)))

    ref_x, ref_gc = reference_forward(x1, x2, x3, raw)
    assert bool(jnp.allclose(out_x, ref_x, rtol=1e-2, atol=1e-2))
    assert bool(jnp.allclose(gc, ref_gc, rtol=1e-2, atol=1e-2))

    print("KERNEL_OK")
</pallas_src>

<mosaic_0001>
module attributes {stable_mosaic.version = 11 : i64} {
  func.func @kernel(%arg0: i32, %arg1: memref<1x4x32xf32, #tpu.memory_space<vmem>>, %arg2: memref<1x8x64xf32, #tpu.memory_space<vmem>>, %arg3: memref<1x16x128xf32, #tpu.memory_space<vmem>>, %arg4: memref<16x4xf32, #tpu.memory_space<vmem>>, %arg5: memref<32x128xf32, #tpu.memory_space<vmem>>, %arg6: memref<16x8xf32, #tpu.memory_space<vmem>>, %arg7: memref<64x128xf32, #tpu.memory_space<vmem>>, %arg8: memref<5x384x128xf32, #tpu.memory_space<vmem>>, %arg9: memref<5x1x128xf32, #tpu.memory_space<vmem>>, %arg10: memref<128x32xf32, #tpu.memory_space<vmem>>, %arg11: memref<1x1xf32, #tpu.memory_space<vmem>>, %arg12: memref<8x16xf32, #tpu.memory_space<vmem>>, %arg13: memref<4x16xf32, #tpu.memory_space<vmem>>, %arg14: memref<2x128x64xf32, #tpu.memory_space<vmem>>, %arg15: memref<4x32x8xf32, #tpu.memory_space<vmem>>, %arg16: memref<16x1xf32, #tpu.memory_space<vmem>>, %arg17: memref<16x1xf32, #tpu.memory_space<vmem>>, %arg18: memref<1x4x8xf32, #tpu.memory_space<vmem>>, %arg19: memref<1x8x64xf32, #tpu.memory_space<vmem>>) attributes {dimension_semantics = [#tpu.dimension_semantics<parallel>], iteration_bounds = array<i64: 1>, scalar_prefetch = 0 : i64, scratch_operands = 0 : i64, tpu.core_type = #tpu.core_type<tc>, window_params = [{transform_indices = @transform_0, window_bounds = array<i64: 1, 4, 32>}, {transform_indices = @transform_1, window_bounds = array<i64: 1, 8, 64>}, {transform_indices = @transform_2, window_bounds = array<i64: 1, 16, 128>}, {pipeline_mode = #tpu.pipeline_mode<synchronous>, transform_indices = @transform_3, window_bounds = array<i64: 16, 4>}, {pipeline_mode = #tpu.pipeline_mode<synchronous>, transform_indices = @transform_4, window_bounds = array<i64: 32, 128>}, {pipeline_mode = #tpu.pipeline_mode<synchronous>, transform_indices = @transform_5, window_bounds = array<i64: 16, 8>}, {pipeline_mode = #tpu.pipeline_mode<synchronous>, transform_indices = @transform_6, window_bounds = array<i64: 64, 128>}, {pipeline_mode = #tpu.pipeline_mode<synchronous>, transform_indices = @transform_7, window_bounds = array<i64: 5, 384, 128>}, {pipeline_mode = #tpu.pipeline_mode<synchronous>, transform_indices = @transform_8, window_bounds = array<i64: 5, 1, 128>}, {pipeline_mode = #tpu.pipeline_mode<synchronous>, transform_indices = @transform_9, window_bounds = array<i64: 128, 32>}, {pipeline_mode = #tpu.pipeline_mode<synchronous>, transform_indices = @transform_10, window_bounds = array<i64: 1, 1>}, {pipeline_mode = #tpu.pipeline_mode<synchronous>, transform_indices = @transform_11, window_bounds = array<i64: 8, 16>}, {pipeline_mode = #tpu.pipeline_mode<synchronous>, transform_indices = @transform_12, window_bounds = array<i64: 4, 16>}, {pipeline_mode = #tpu.pipeline_mode<synchronous>, transform_indices = @transform_13, window_bounds = array<i64: 2, 128, 64>}, {pipeline_mode = #tpu.pipeline_mode<synchronous>, transform_indices = @transform_14, window_bounds = array<i64: 4, 32, 8>}, {pipeline_mode = #tpu.pipeline_mode<synchronous>, transform_indices = @transform_15, window_bounds = array<i64: 16, 1>}, {pipeline_mode = #tpu.pipeline_mode<synchronous>, transform_indices = @transform_16, window_bounds = array<i64: 16, 1>}, {transform_indices = @transform_17, window_bounds = array<i64: 1, 4, 8>}, {transform_indices = @transform_18, window_bounds = array<i64: 1, 8, 64>}]} {
    %c0 = arith.constant 0 : index
    %c0_0 = arith.constant 0 : index
    %0 = vector.load %arg16[%c0, %c0_0] : memref<16x1xf32, #tpu.memory_space<vmem>>, vector<16x1xf32>
    %c0_1 = arith.constant 0 : index
    %c0_2 = arith.constant 0 : index
    %1 = vector.load %arg17[%c0_1, %c0_2] : memref<16x1xf32, #tpu.memory_space<vmem>>, vector<16x1xf32>
    %c0_3 = arith.constant 0 : index
    %c0_4 = arith.constant 0 : index
    %c0_5 = arith.constant 0 : index
    %2 = vector.load %arg1[%c0_3, %c0_4, %c0_5] : memref<1x4x32xf32, #tpu.memory_space<vmem>>, vector<1x4x32xf32>
    %3 = vector.shape_cast %2 : vector<1x4x32xf32> to vector<4x32xf32>
    %c0_6 = arith.constant 0 : index
    %c0_7 = arith.constant 0 : index
    %c0_8 = arith.constant 0 : index
    %4 = vector.load %arg2[%c0_6, %c0_7, %c0_8] : memref<1x8x64xf32, #tpu.memory_space<vmem>>, vector<1x8x64xf32>
    %5 = vector.shape_cast %4 : vector<1x8x64xf32> to vector<8x64xf32>
    %c0_9 = arith.constant 0 : index
    %c0_10 = arith.constant 0 : index
    %c0_11 = arith.constant 0 : index
    %6 = vector.load %arg3[%c0_9, %c0_10, %c0_11] : memref<1x16x128xf32, #tpu.memory_space<vmem>>, vector<1x16x128xf32>
    %7 = vector.shape_cast %6 : vector<1x16x128xf32> to vector<16x128xf32>
    %c0_12 = arith.constant 0 : index
    %c0_13 = arith.constant 0 : index
    %8 = vector.load %arg4[%c0_12, %c0_13] : memref<16x4xf32, #tpu.memory_space<vmem>>, vector<16x4xf32>
    %cst = arith.constant dense<0.000000e+00> : vector<16x32xf32>
    %9 = tpu.matmul %8, %3, %cst {dimension_numbers = #tpu.dot_dimension_numbers<[1], [0], [0], [1], [0, 0, 1, 1], [], []>} : vector<16x4xf32>, vector<4x32xf32>, vector<16x32xf32> -> vector<16x32xf32>
    %c0_14 = arith.constant 0 : index
    %c0_15 = arith.constant 0 : index
    %10 = vector.load %arg5[%c0_14, %c0_15] : memref<32x128xf32, #tpu.memory_space<vmem>>, vector<32x128xf32>
    %cst_16 = arith.constant dense<0.000000e+00> : vector<16x128xf32>
    %11 = tpu.matmul %9, %10, %cst_16 {dimension_numbers = #tpu.dot_dimension_numbers<[1], [0], [0], [1], [0, 0, 1, 1], [], []>} : vector<16x32xf32>, vector<32x128xf32>, vector<16x128xf32> -> vector<16x128xf32>
    %c0_17 = arith.constant 0 : index
    %c0_18 = arith.constant 0 : index
    %12 = vector.load %arg6[%c0_17, %c0_18] : memref<16x8xf32, #tpu.memory_space<vmem>>, vector<16x8xf32>
    %cst_19 = arith.constant dense<0.000000e+00> : vector<16x64xf32>
    %13 = tpu.matmul %12, %5, %cst_19 {dimension_numbers = #tpu.dot_dimension_numbers<[1], [0], [0], [1], [0, 0, 1, 1], [], []>} : vector<16x8xf32>, vector<8x64xf32>, vector<16x64xf32> -> vector<16x64xf32>
    %c0_20 = arith.constant 0 : index
    %c0_21 = arith.constant 0 : index
    %14 = vector.load %arg7[%c0_20, %c0_21] : memref<64x128xf32, #tpu.memory_space<vmem>>, vector<64x128xf32>
    %cst_22 = arith.constant dense<0.000000e+00> : vector<16x128xf32>
    %15 = tpu.matmul %13, %14, %cst_22 {dimension_numbers = #tpu.dot_dimension_numbers<[1], [0], [0], [1], [0, 0, 1, 1], [], []>} : vector<16x64xf32>, vector<64x128xf32>, vector<16x128xf32> -> vector<16x128xf32>
    %c1_i32 = arith.constant 1 : i32
    %16 = tpu.dynamic_rotate %11 by %c1_i32 dim 0 : vector<16x128xf32>, i32 -> vector<16x128xf32>
    %17 = vector.broadcast %0 : vector<16x1xf32> to vector<16x128xf32>
    %18 = arith.mulf %16, %17 : vector<16x128xf32>
    %c15_i32 = arith.constant 15 : i32
    %19 = tpu.dynamic_rotate %11 by %c15_i32 dim 0 : vector<16x128xf32>, i32 -> vector<16x128xf32>
    %20 = vector.broadcast %1 : vector<16x1xf32> to vector<16x128xf32>
    %21 = arith.mulf %19, %20 : vector<16x128xf32>
    %c0_23 = arith.constant 0 : index
    %c0_24 = arith.constant 0 : index
    %c0_25 = arith.constant 0 : index
    %22 = vector.load %arg8[%c0_23, %c0_24, %c0_25] : memref<5x384x128xf32, #tpu.memory_space<vmem>>, vector<1x384x128xf32>
    %23 = vector.shape_cast %22 : vector<1x384x128xf32> to vector<384x128xf32>
    %24 = tpu.concatenate %18, %11, %21 in 1 : vector<16x128xf32>, vector<16x128xf32>, vector<16x128xf32> -> vector<16x384xf32>
    %cst_26 = arith.constant dense<0.000000e+00> : vector<16x128xf32>
    %25 = tpu.matmul %24, %23, %cst_26 {dimension_numbers = #tpu.dot_dimension_numbers<[1], [0], [0], [1], [0, 0, 1, 1], [], []>} : vector<16x384xf32>, vector<384x128xf32>, vector<16x128xf32> -> vector<16x128xf32>
    %c0_27 = arith.constant 0 : index
    %c0_28 = arith.constant 0 : index
    %c0_29 = arith.constant 0 : index
    %26 = vector.load %arg9[%c0_27, %c0_28, %c0_29] : memref<5x1x128xf32, #tpu.memory_space<vmem>>, vector<1x1x128xf32>
    %27 = vector.shape_cast %26 : vector<1x1x128xf32> to vector<1x128xf32>
    %28 = vector.broadcast %27 : vector<1x128xf32> to vector<16x128xf32>
    %29 = arith.addf %25, %28 : vector<16x128xf32>
    %cst_30 = arith.constant 0.000000e+00 : f32
    %30 = vector.broadcast %cst_30 : f32 to vector<16x128xf32>
    %31 = arith.maximumf %29, %30 : vector<16x128xf32>
    %c1_i32_31 = arith.constant 1 : i32
    %32 = tpu.dynamic_rotate %15 by %c1_i32_31 dim 0 : vector<16x128xf32>, i32 -> vector<16x128xf32>
    %33 = vector.broadcast %0 : vector<16x1xf32> to vector<16x128xf32>
    %34 = arith.mulf %32, %33 : vector<16x128xf32>
    %c15_i32_32 = arith.constant 15 : i32
    %35 = tpu.dynamic_rotate %15 by %c15_i32_32 dim 0 : vector<16x128xf32>, i32 -> vector<16x128xf32>
    %36 = vector.broadcast %1 : vector<16x1xf32> to vector<16x128xf32>
    %37 = arith.mulf %35, %36 : vector<16x128xf32>
    %c1 = arith.constant 1 : index
    %c0_33 = arith.constant 0 : index
    %c0_34 = arith.constant 0 : index
    %38 = vector.load %arg8[%c1, %c0_33, %c0_34] : memref<5x384x128xf32, #tpu.memory_space<vmem>>, vector<1x384x128xf32>
    %39 = vector.shape_cast %38 : vector<1x384x128xf32> to vector<384x128xf32>
    %40 = tpu.concatenate %34, %15, %37 in 1 : vector<16x128xf32>, vector<16x128xf32>, vector<16x128xf32> -> vector<16x384xf32>
    %cst_35 = arith.constant dense<0.000000e+00> : vector<16x128xf32>
    %41 = tpu.matmul %40, %39, %cst_35 {dimension_numbers = #tpu.dot_dimension_numbers<[1], [0], [0], [1], [0, 0, 1, 1], [], []>} : vector<16x384xf32>, vector<384x128xf32>, vector<16x128xf32> -> vector<16x128xf32>
    %c1_36 = arith.constant 1 : index
    %c0_37 = arith.constant 0 : index
    %c0_38 = arith.constant 0 : index
    %42 = vector.load %arg9[%c1_36, %c0_37, %c0_38] : memref<5x1x128xf32, #tpu.memory_space<vmem>>, vector<1x1x128xf32>
    %43 = vector.shape_cast %42 : vector<1x1x128xf32> to vector<1x128xf32>
    %44 = vector.broadcast %43 : vector<1x128xf32> to vector<16x128xf32>
    %45 = arith.addf %41, %44 : vector<16x128xf32>
    %cst_39 = arith.constant 0.000000e+00 : f32
    %46 = vector.broadcast %cst_39 : f32 to vector<16x128xf32>
    %47 = arith.maximumf %45, %46 : vector<16x128xf32>
    %48 = arith.subf %7, %31 : vector<16x128xf32>
    %c1_i32_40 = arith.constant 1 : i32
    %49 = tpu.dynamic_rotate %48 by %c1_i32_40 dim 0 : vector<16x128xf32>, i32 -> vector<16x128xf32>
    %50 = vector.broadcast %0 : vector<16x1xf32> to vector<16x128xf32>
    %51 = arith.mulf %49, %50 : vector<16x128xf32>
    %c15_i32_41 = arith.constant 15 : i32
    %52 = tpu.dynamic_rotate %48 by %c15_i32_41 dim 0 : vector<16x128xf32>, i32 -> vector<16x128xf32>
    %53 = vector.broadcast %1 : vector<16x1xf32> to vector<16x128xf32>
    %54 = arith.mulf %52, %53 : vector<16x128xf32>
    %c2 = arith.constant 2 : index
    %c0_42 = arith.constant 0 : index
    %c0_43 = arith.constant 0 : index
    %55 = vector.load %arg8[%c2, %c0_42, %c0_43] : memref<5x384x128xf32, #tpu.memory_space<vmem>>, vector<1x384x128xf32>
    %56 = vector.shape_cast %55 : vector<1x384x128xf32> to vector<384x128xf32>
    %57 = tpu.concatenate %51, %48, %54 in 1 : vector<16x128xf32>, vector<16x128xf32>, vector<16x128xf32> -> vector<16x384xf32>
    %cst_44 = arith.constant dense<0.000000e+00> : vector<16x128xf32>
    %58 = tpu.matmul %57, %56, %cst_44 {dimension_numbers = #tpu.dot_dimension_numbers<[1], [0], [0], [1], [0, 0, 1, 1], [], []>} : vector<16x384xf32>, vector<384x128xf32>, vector<16x128xf32> -> vector<16x128xf32>
    %c2_45 = arith.constant 2 : index
    %c0_46 = arith.constant 0 : index
    %c0_47 = arith.constant 0 : index
    %59 = vector.load %arg9[%c2_45, %c0_46, %c0_47] : memref<5x1x128xf32, #tpu.memory_space<vmem>>, vector<1x1x128xf32>
    %60 = vector.shape_cast %59 : vector<1x1x128xf32> to vector<1x128xf32>
    %61 = vector.broadcast %60 : vector<1x128xf32> to vector<16x128xf32>
    %62 = arith.addf %58, %61 : vector<16x128xf32>
    %cst_48 = arith.constant 0.000000e+00 : f32
    %63 = vector.broadcast %cst_48 : f32 to vector<16x128xf32>
    %64 = arith.maximumf %62, %63 : vector<16x128xf32>
    %65 = arith.subf %47, %31 : vector<16x128xf32>
    %c1_i32_49 = arith.constant 1 : i32
    %66 = tpu.dynamic_rotate %65 by %c1_i32_49 dim 0 : vector<16x128xf32>, i32 -> vector<16x128xf32>
    %67 = vector.broadcast %0 : vector<16x1xf32> to vector<16x128xf32>
    %68 = arith.mulf %66, %67 : vector<16x128xf32>
    %c15_i32_50 = arith.constant 15 : i32
    %69 = tpu.dynamic_rotate %65 by %c15_i32_50 dim 0 : vector<16x128xf32>, i32 -> vector<16x128xf32>
    %70 = vector.broadcast %1 : vector<16x1xf32> to vector<16x128xf32>
    %71 = arith.mulf %69, %70 : vector<16x128xf32>
    %c3 = arith.constant 3 : index
    %c0_51 = arith.constant 0 : index
    %c0_52 = arith.constant 0 : index
    %72 = vector.load %arg8[%c3, %c0_51, %c0_52] : memref<5x384x128xf32, #tpu.memory_space<vmem>>, vector<1x384x128xf32>
    %73 = vector.shape_cast %72 : vector<1x384x128xf32> to vector<384x128xf32>
    %74 = tpu.concatenate %68, %65, %71 in 1 : vector<16x128xf32>, vector<16x128xf32>, vector<16x128xf32> -> vector<16x384xf32>
    %cst_53 = arith.constant dense<0.000000e+00> : vector<16x128xf32>
    %75 = tpu.matmul %74, %73, %cst_53 {dimension_numbers = #tpu.dot_dimension_numbers<[1], [0], [0], [1], [0, 0, 1, 1], [], []>} : vector<16x384xf32>, vector<384x128xf32>, vector<16x128xf32> -> vector<16x128xf32>
    %c3_54 = arith.constant 3 : index
    %c0_55 = arith.constant 0 : index
    %c0_56 = arith.constant 0 : index
    %76 = vector.load %arg9[%c3_54, %c0_55, %c0_56] : memref<5x1x128xf32, #tpu.memory_space<vmem>>, vector<1x1x128xf32>
    %77 = vector.shape_cast %76 : vector<1x1x128xf32> to vector<1x128xf32>
    %78 = vector.broadcast %77 : vector<1x128xf32> to vector<16x128xf32>
    %79 = arith.addf %75, %78 : vector<16x128xf32>
    %cst_57 = arith.constant 0.000000e+00 : f32
    %80 = vector.broadcast %cst_57 : f32 to vector<16x128xf32>
    %81 = arith.maximumf %79, %80 : vector<16x128xf32>
    %82 = arith.addf %64, %81 : vector<16x128xf32>
    %83 = arith.addf %82, %31 : vector<16x128xf32>
    %c1_i32_58 = arith.constant 1 : i32
    %84 = tpu.dynamic_rotate %83 by %c1_i32_58 dim 0 : vector<16x128xf32>, i32 -> vector<16x128xf32>
    %85 = vector.broadcast %0 : vector<16x1xf32> to vector<16x128xf32>
    %86 = arith.mulf %84, %85 : vector<16x128xf32>
    %c15_i32_59 = arith.constant 15 : i32
    %87 = tpu.dynamic_rotate %83 by %c15_i32_59 dim 0 : vector<16x128xf32>, i32 -> vector<16x128xf32>
    %88 = vector.broadcast %1 : vector<16x1xf32> to vector<16x128xf32>
    %89 = arith.mulf %87, %88 : vector<16x128xf32>
    %c4 = arith.constant 4 : index
    %c0_60 = arith.constant 0 : index
    %c0_61 = arith.constant 0 : index
    %90 = vector.load %arg8[%c4, %c0_60, %c0_61] : memref<5x384x128xf32, #tpu.memory_space<vmem>>, vector<1x384x128xf32>
    %91 = vector.shape_cast %90 : vector<1x384x128xf32> to vector<384x128xf32>
    %92 = tpu.concatenate %86, %83, %89 in 1 : vector<16x128xf32>, vector<16x128xf32>, vector<16x128xf32> -> vector<16x384xf32>
    %cst_62 = arith.constant dense<0.000000e+00> : vector<16x128xf32>
    %93 = tpu.matmul %92, %91, %cst_62 {dimension_numbers = #tpu.dot_dimension_numbers<[1], [0], [0], [1], [0, 0, 1, 1], [], []>} : vector<16x384xf32>, vector<384x128xf32>, vector<16x128xf32> -> vector<16x128xf32>
    %c4_63 = arith.constant 4 : index
    %c0_64 = arith.constant 0 : index
    %c0_65 = arith.constant 0 : index
    %94 = vector.load %arg9[%c4_63, %c0_64, %c0_65] : memref<5x1x128xf32, #tpu.memory_space<vmem>>, vector<1x1x128xf32>
    %95 = vector.shape_cast %94 : vector<1x1x128xf32> to vector<1x128xf32>
    %96 = vector.broadcast %95 : vector<1x128xf32> to vector<16x128xf32>
    %97 = arith.addf %93, %96 : vector<16x128xf32>
    %cst_66 = arith.constant 0.000000e+00 : f32
    %98 = vector.broadcast %cst_66 : f32 to vector<16x128xf32>
    %99 = arith.maximumf %97, %98 : vector<16x128xf32>
    %c0_67 = arith.constant 0 : index
    %c0_68 = arith.constant 0 : index
    %100 = vector.load %arg10[%c0_67, %c0_68] : memref<128x32xf32, #tpu.memory_space<vmem>>, vector<128x32xf32>
    %cst_69 = arith.constant dense<0.000000e+00> : vector<16x32xf32>
    %101 = tpu.matmul %99, %100, %cst_69 {dimension_numbers = #tpu.dot_dimension_numbers<[1], [0], [0], [1], [0, 0, 1, 1], [], []>} : vector<16x128xf32>, vector<128x32xf32>, vector<16x32xf32> -> vector<16x32xf32>
    %c0_70 = arith.constant 0 : index
    %c0_71 = arith.constant 0 : index
    %102 = vector.load %arg11[%c0_70, %c0_71] : memref<1x1xf32, #tpu.memory_space<vmem>>, vector<1x1xf32>
    %103 = vector.broadcast %102 : vector<1x1xf32> to vector<16x32xf32>
    %104 = arith.addf %101, %103 : vector<16x32xf32>
    %c15_i32_72 = arith.constant 15 : i32
    %105 = tpu.dynamic_rotate %104 by %c15_i32_72 dim 0 : vector<16x32xf32>, i32 -> vector<16x32xf32>
    %106 = arith.maximumf %104, %105 : vector<16x32xf32>
    %c14_i32 = arith.constant 14 : i32
    %107 = tpu.dynamic_rotate %104 by %c14_i32 dim 0 : vector<16x32xf32>, i32 -> vector<16x32xf32>
    %c13_i32 = arith.constant 13 : i32
    %108 = tpu.dynamic_rotate %104 by %c13_i32 dim 0 : vector<16x32xf32>, i32 -> vector<16x32xf32>
    %109 = arith.maximumf %107, %108 : vector<16x32xf32>
    %110 = arith.maximumf %106, %109 : vector<16x32xf32>
    %c0_73 = arith.constant 0 : index
    %c0_74 = arith.constant 0 : index
    %111 = vector.load %arg13[%c0_73, %c0_74] : memref<4x16xf32, #tpu.memory_space<vmem>>, vector<4x16xf32>
    %cst_75 = arith.constant dense<0.000000e+00> : vector<4x32xf32>
    %112 = tpu.matmul %111, %110, %cst_75 {dimension_numbers = #tpu.dot_dimension_numbers<[1], [0], [0], [1], [0, 0, 1, 1], [], []>} : vector<4x16xf32>, vector<16x32xf32>, vector<4x32xf32> -> vector<4x32xf32>
    %c0_76 = arith.constant 0 : index
    %c0_77 = arith.constant 0 : index
    %c0_78 = arith.constant 0 : index
    %113 = vector.load %arg15[%c0_76, %c0_77, %c0_78] : memref<4x32x8xf32, #tpu.memory_space<vmem>>, vector<1x32x8xf32>
    %114 = vector.shape_cast %113 : vector<1x32x8xf32> to vector<32x8xf32>
    %cst_79 = arith.constant dense<0.000000e+00> : vector<4x8xf32>
    %115 = tpu.matmul %112, %114, %cst_79 {dimension_numbers = #tpu.dot_dimension_numbers<[1], [0], [0], [1], [0, 0, 1, 1], [], []>} : vector<4x32xf32>, vector<32x8xf32>, vector<4x8xf32> -> vector<4x8xf32>
    %c1_80 = arith.constant 1 : index
    %c0_81 = arith.constant 0 : index
    %c0_82 = arith.constant 0 : index
    %116 = vector.load %arg15[%c1_80, %c0_81, %c0_82] : memref<4x32x8xf32, #tpu.memory_space<vmem>>, vector<1x32x8xf32>
    %117 = vector.shape_cast %116 : vector<1x32x8xf32> to vector<32x8xf32>
    %cst_83 = arith.constant dense<0.000000e+00> : vector<4x8xf32>
    %118 = tpu.matmul %112, %117, %cst_83 {dimension_numbers = #tpu.dot_dimension_numbers<[1], [0], [0], [1], [0, 0, 1, 1], [], []>} : vector<4x32xf32>, vector<32x8xf32>, vector<4x8xf32> -> vector<4x8xf32>
    %119 = arith.maximumf %115, %118 : vector<4x8xf32>
    %c2_84 = arith.constant 2 : index
    %c0_85 = arith.constant 0 : index
    %c0_86 = arith.constant 0 : index
    %120 = vector.load %arg15[%c2_84, %c0_85, %c0_86] : memref<4x32x8xf32, #tpu.memory_space<vmem>>, vector<1x32x8xf32>
    %121 = vector.shape_cast %120 : vector<1x32x8xf32> to vector<32x8xf32>
    %cst_87 = arith.constant dense<0.000000e+00> : vector<4x8xf32>
    %122 = tpu.matmul %112, %121, %cst_87 {dimension_numbers = #tpu.dot_dimension_numbers<[1], [0], [0], [1], [0, 0, 1, 1], [], []>} : vector<4x32xf32>, vector<32x8xf32>, vector<4x8xf32> -> vector<4x8xf32>
    %c3_88 = arith.constant 3 : index
    %c0_89 = arith.constant 0 : index
    %c0_90 = arith.constant 0 : index
    %123 = vector.load %arg15[%c3_88, %c0_89, %c0_90] : memref<4x32x8xf32, #tpu.memory_space<vmem>>, vector<1x32x8xf32>
    %124 = vector.shape_cast %123 : vector<1x32x8xf32> to vector<32x8xf32>
    %cst_91 = arith.constant dense<0.000000e+00> : vector<4x8xf32>
    %125 = tpu.matmul %112, %124, %cst_91 {dimension_numbers = #tpu.dot_dimension_numbers<[1], [0], [0], [1], [0, 0, 1, 1], [], []>} : vector<4x32xf32>, vector<32x8xf32>, vector<4x8xf32> -> vector<4x8xf32>
    %126 = arith.maximumf %122, %125 : vector<4x8xf32>
    %127 = arith.maximumf %119, %126 : vector<4x8xf32>
    %c0_92 = arith.constant 0 : index
    %c0_93 = arith.constant 0 : index
    %c0_94 = arith.constant 0 : index
    %128 = vector.load %arg18[%c0_92, %c0_93, %c0_94] : memref<1x4x8xf32, #tpu.memory_space<vmem>>, vector<1x4x8xf32>
    %129 = vector.shape_cast %128 : vector<1x4x8xf32> to vector<4x8xf32>
    %130 = vector.shape_cast %127 : vector<4x8xf32> to vector<1x4x8xf32>
    tpu.vector_store %arg18[%c0_92, %c0_93, %c0_94], %130 {strides = array<i32>} : memref<1x4x8xf32, #tpu.memory_space<vmem>>, vector<1x4x8xf32>,
    %c15_i32_95 = arith.constant 15 : i32
    %131 = tpu.dynamic_rotate %99 by %c15_i32_95 dim 0 : vector<16x128xf32>, i32 -> vector<16x128xf32>
    %132 = arith.maximumf %99, %131 : vector<16x128xf32>
    %c0_96 = arith.constant 0 : index
    %c0_97 = arith.constant 0 : index
    %133 = vector.load %arg12[%c0_96, %c0_97] : memref<8x16xf32, #tpu.memory_space<vmem>>, vector<8x16xf32>
    %cst_98 = arith.constant dense<0.000000e+00> : vector<8x128xf32>
    %134 = tpu.matmul %133, %132, %cst_98 {dimension_numbers = #tpu.dot_dimension_numbers<[1], [0], [0], [1], [0, 0, 1, 1], [], []>} : vector<8x16xf32>, vector<16x128xf32>, vector<8x128xf32> -> vector<8x128xf32>
    %c0_99 = arith.constant 0 : index
    %c0_100 = arith.constant 0 : index
    %c0_101 = arith.constant 0 : index
    %135 = vector.load %arg14[%c0_99, %c0_100, %c0_101] : memref<2x128x64xf32, #tpu.memory_space<vmem>>, vector<1x128x64xf32>
    %136 = vector.shape_cast %135 : vector<1x128x64xf32> to vector<128x64xf32>
    %cst_102 = arith.constant dense<0.000000e+00> : vector<8x64xf32>
    %137 = tpu.matmul %134, %136, %cst_102 {dimension_numbers = #tpu.dot_dimension_numbers<[1], [0], [0], [1], [0, 0, 1, 1], [], []>} : vector<8x128xf32>, vector<128x64xf32>, vector<8x64xf32> -> vector<8x64xf32>
    %c1_103 = arith.constant 1 : index
    %c0_104 = arith.constant 0 : index
    %c0_105 = arith.constant 0 : index
    %138 = vector.load %arg14[%c1_103, %c0_104, %c0_105] : memref<2x128x64xf32, #tpu.memory_space<vmem>>, vector<1x128x64xf32>
    %139 = vector.shape_cast %138 : vector<1x128x64xf32> to vector<128x64xf32>
    %cst_106 = arith.constant dense<0.000000e+00> : vector<8x64xf32>
    %140 = tpu.matmul %134, %139, %cst_106 {dimension_numbers = #tpu.dot_dimension_numbers<[1], [0], [0], [1], [0, 0, 1, 1], [], []>} : vector<8x128xf32>, vector<128x64xf32>, vector<8x64xf32> -> vector<8x64xf32>
    %141 = arith.maximumf %137, %140 : vector<8x64xf32>
    %c0_107 = arith.constant 0 : index
    %c0_108 = arith.constant 0 : index
    %c0_109 = arith.constant 0 : index
    %142 = vector.load %arg19[%c0_107, %c0_108, %c0_109] : memref<1x8x64xf32, #tpu.memory_space<vmem>>, vector<1x8x64xf32>
    %143 = vector.shape_cast %142 : vector<1x8x64xf32> to vector<8x64xf32>
    %144 = vector.shape_cast %141 : vector<8x64xf32> to vector<1x8x64xf32>
    tpu.vector_store %arg19[%c0_107, %c0_108, %c0_109], %144 {strides = array<i32>} : memref<1x8x64xf32, #tpu.memory_space<vmem>>, vector<1x8x64xf32>,
    return
  }
  func.func @transform_0(%arg0: i32) -> (i32, i32, i32) {
    %c0_i32 = arith.constant 0 : i32
    %c0_i32_0 = arith.constant 0 : i32
    %c0_i32_1 = arith.constant 0 : i32
    return %arg0, %c0_i32, %c0_i32_0 : i32, i32, i32
  }
  func.func @transform_1(%arg0: i32) -> (i32, i32, i32) {
    %c0_i32 = arith.constant 0 : i32
    %c0_i32_0 = arith.constant 0 : i32
    %c0_i32_1 = arith.constant 0 : i32
    return %arg0, %c0_i32, %c0_i32_0 : i32, i32, i32
  }
  func.func @transform_2(%arg0: i32) -> (i32, i32, i32) {
    %c0_i32 = arith.constant 0 : i32
    %c0_i32_0 = arith.constant 0 : i32
    %c0_i32_1 = arith.constant 0 : i32
    return %arg0, %c0_i32, %c0_i32_0 : i32, i32, i32
  }
  func.func @transform_3(%arg0: i32) -> (i32, i32) {
    %c0_i32 = arith.constant 0 : i32
    %c0_i32_0 = arith.constant 0 : i32
    %c0_i32_1 = arith.constant 0 : i32
    return %c0_i32, %c0_i32_0 : i32, i32
  }
  func.func @transform_4(%arg0: i32) -> (i32, i32) {
    %c0_i32 = arith.constant 0 : i32
    %c0_i32_0 = arith.constant 0 : i32
    %c0_i32_1 = arith.constant 0 : i32
    return %c0_i32, %c0_i32_0 : i32, i32
  }
  func.func @transform_5(%arg0: i32) -> (i32, i32) {
    %c0_i32 = arith.constant 0 : i32
    %c0_i32_0 = arith.constant 0 : i32
    %c0_i32_1 = arith.constant 0 : i32
    return %c0_i32, %c0_i32_0 : i32, i32
  }
  func.func @transform_6(%arg0: i32) -> (i32, i32) {
    %c0_i32 = arith.constant 0 : i32
    %c0_i32_0 = arith.constant 0 : i32
    %c0_i32_1 = arith.constant 0 : i32
    return %c0_i32, %c0_i32_0 : i32, i32
  }
  func.func @transform_7(%arg0: i32) -> (i32, i32, i32) {
    %c0_i32 = arith.constant 0 : i32
    %c0_i32_0 = arith.constant 0 : i32
    %c0_i32_1 = arith.constant 0 : i32
    %c0_i32_2 = arith.constant 0 : i32
    return %c0_i32, %c0_i32_0, %c0_i32_1 : i32, i32, i32
  }
  func.func @transform_8(%arg0: i32) -> (i32, i32, i32) {
    %c0_i32 = arith.constant 0 : i32
    %c0_i32_0 = arith.constant 0 : i32
    %c0_i32_1 = arith.constant 0 : i32
    %c0_i32_2 = arith.constant 0 : i32
    return %c0_i32, %c0_i32_0, %c0_i32_1 : i32, i32, i32
  }
  func.func @transform_9(%arg0: i32) -> (i32, i32) {
    %c0_i32 = arith.constant 0 : i32
    %c0_i32_0 = arith.constant 0 : i32
    %c0_i32_1 = arith.constant 0 : i32
    return %c0_i32, %c0_i32_0 : i32, i32
  }
  func.func @transform_10(%arg0: i32) -> (i32, i32) {
    %c0_i32 = arith.constant 0 : i32
    %c0_i32_0 = arith.constant 0 : i32
    %c0_i32_1 = arith.constant 0 : i32
    return %c0_i32, %c0_i32_0 : i32, i32
  }
  func.func @transform_11(%arg0: i32) -> (i32, i32) {
    %c0_i32 = arith.constant 0 : i32
    %c0_i32_0 = arith.constant 0 : i32
    %c0_i32_1 = arith.constant 0 : i32
    return %c0_i32, %c0_i32_0 : i32, i32
  }
  func.func @transform_12(%arg0: i32) -> (i32, i32) {
    %c0_i32 = arith.constant 0 : i32
    %c0_i32_0 = arith.constant 0 : i32
    %c0_i32_1 = arith.constant 0 : i32
    return %c0_i32, %c0_i32_0 : i32, i32
  }
  func.func @transform_13(%arg0: i32) -> (i32, i32, i32) {
    %c0_i32 = arith.constant 0 : i32
    %c0_i32_0 = arith.constant 0 : i32
    %c0_i32_1 = arith.constant 0 : i32
    %c0_i32_2 = arith.constant 0 : i32
    return %c0_i32, %c0_i32_0, %c0_i32_1 : i32, i32, i32
  }
  func.func @transform_14(%arg0: i32) -> (i32, i32, i32) {
    %c0_i32 = arith.constant 0 : i32
    %c0_i32_0 = arith.constant 0 : i32
    %c0_i32_1 = arith.constant 0 : i32
    %c0_i32_2 = arith.constant 0 : i32
    return %c0_i32, %c0_i32_0, %c0_i32_1 : i32, i32, i32
  }
  func.func @transform_15(%arg0: i32) -> (i32, i32) {
    %c0_i32 = arith.constant 0 : i32
    %c0_i32_0 = arith.constant 0 : i32
    %c0_i32_1 = arith.constant 0 : i32
    return %c0_i32, %c0_i32_0 : i32, i32
  }
  func.func @transform_16(%arg0: i32) -> (i32, i32) {
    %c0_i32 = arith.constant 0 : i32
    %c0_i32_0 = arith.constant 0 : i32
    %c0_i32_1 = arith.constant 0 : i32
    return %c0_i32, %c0_i32_0 : i32, i32
  }
  func.func @transform_17(%arg0: i32) -> (i32, i32, i32) {
    %c0_i32 = arith.constant 0 : i32
    %c0_i32_0 = arith.constant 0 : i32
    %c0_i32_1 = arith.constant 0 : i32
    return %arg0, %c0_i32, %c0_i32_0 : i32, i32, i32
  }
  func.func @transform_18(%arg0: i32) -> (i32, i32, i32) {
    %c0_i32 = arith.constant 0 : i32
    %c0_i32_0 = arith.constant 0 : i32
    %c0_i32_1 = arith.constant 0 : i32
    return %arg0, %c0_i32, %c0_i32_0 : i32, i32, i32
  }
}

</mosaic_0001>

<bundles_post_ra>
// kernel: aggregation_forward.1
= control target key start
LH: loop header
LB: loop body
LE: loop exit
PB: predicated region body
PF: predicated region fallthrough
CT: control target
= control target key end

     0   :  { %s4202_s0 = inlined_call_operand.vmem [shape: f32[1,4,32], index: 0, kind: input, shape index: {}]   ;;  %s4203_s1 = inlined_call_operand.vmem [shape: f32[1,8,64], index: 1, kind: input, shape index: {}]   ;;  %s4204_s2 = inlined_call_operand.vmem [shape: f32[1,16,128], index: 2, kind: input, shape index: {}]   ;;  %s4205_s3 = inlined_call_operand.vmem [shape: f32[16,4], index: 3, kind: input, shape index: {}]   ;;  %s4206_s4 = inlined_call_operand.vmem [shape: f32[32,128], index: 4, kind: input, shape index: {}]   ;;  %s4207_s5 = inlined_call_operand.vmem [shape: f32[16,8], index: 5, kind: input, shape index: {}]   ;;  %s4208_s6 = inlined_call_operand.vmem [shape: f32[64,128], index: 6, kind: input, shape index: {}]   ;;  %s4209_s7 = inlined_call_operand.hbm [shape: f32[5,384,128], index: 7, kind: input, shape index: {}]   ;;  %s4210_s8 = inlined_call_operand.vmem [shape: f32[5,1,128], index: 8, kind: input, shape index: {}]   ;;  %s4211_s9 = inlined_call_operand.vmem [shape: f32[128,32], index: 9, kind: input, shape index: {}]   ;;  %s4212_s10 = inlined_call_operand.<no memory space> [shape: f32[1,1], index: 10, kind: input, shape index: {}]   ;;  %s4213_s11 = inlined_call_operand.vmem [shape: f32[8,16], index: 11, kind: input, shape index: {}]   ;;  %s4214_s12 = inlined_call_operand.vmem [shape: f32[4,16], index: 12, kind: input, shape index: {}]   ;;  %s4215_s13 = inlined_call_operand.vmem [shape: f32[2,128,64], index: 13, kind: input, shape index: {}]   ;;  %s4216_s14 = inlined_call_operand.vmem [shape: f32[4,32,8], index: 14, kind: input, shape index: {}]   ;;  %s4217_s15 = inlined_call_operand.vmem [shape: f32[16,1], index: 15, kind: input, shape index: {}]   ;;  %s4218_s16 = inlined_call_operand.vmem [shape: f32[16,1], index: 16, kind: input, shape index: {}]   ;;  %s4219_s17 = inlined_call_operand.vmem [shape: f32[1,4,8], index: 17, kind: output, shape index: {0}]   ;;  %s4220_s18 = inlined_call_operand.vmem [shape: f32[1,8,64], index: 18, kind: output, shape index: {1}]  }
   0x1   :  { %4222 = sst [smem:[#allocation6_spill]] %s4202_s0  ;;  %v24_v0 = vstv %s4212_s10 }
   0x2   :  { %4223 = sst [smem:[#allocation7_spill]] %s4203_s1  ;;  %25 = vst [vmem:[#allocation2] sm:$0x1] %v24_v0 }
   0x3   :  { %4224 = sst [smem:[#allocation8_spill]] %s4204_s2 }
   0x4   :  { %26 = vsyncpa [#allocation4], 0  ;;  %s3630_s29 = smov [#allocation3]   ;;  %s3606_s1 = scalar_lea.hbm %s4209_s7, 30720 }
   0x5   :  { %s46_s30 = sshll.u32 %s3630_s29, 4  ;;  %p3607_p0 = scmp.ne.s32.totalorder %s4209_s7, %s3606_s1  ;;  %s47_s30 = int_to_ptr.vmem [resolvable:$true] %s46_s30 }
   0x6   :  { %p3610_p1 = scmp.lt.u32.totalorder %s3606_s1, %s4209_s7 }
   0x8   :  { %p3612_p2 = pnand %p3610_p1, %p3607_p0 }
   0xa   :  { %3615 = shalt.err (!%p3612_p2)
}
   0xb   :  { %s3616_s10 = scalar_lea.vmem %s47_s30, 30720  ;;  %p3621_p4 = scmp.lt.s32.totalorder %s47_s30, %s47_s30 }
   0xc   :  { %p3617_p3 = scmp.ne.s32.totalorder %s47_s30, %s3616_s10  ;;  %p3622_p5 = scmp.lt.s32.totalorder %s3616_s10, %s3616_s10 }
   0xe   :  { %p3623_p6 = por %p3622_p5, %p3621_p4 }
  0x10   :  { %p3624_p7 = pnand %p3623_p6, %p3617_p3 }
  0x12   :  { %3627 = shalt.err (!%p3624_p7)
}
  0x13   :  { %s3631_s23 = smov 128   ;;  %s3632_s24 = smov 8  }
  0x14   :  { %52 = dma.hbm_to_vmem [thread:$0]  %s4209_s7, 30720, %s47_s30, [#allocation4], %s3631_s23, %s3631_s23, %s3632_s24  }
  0x15   :  { %3628 = dma.done.wait [#allocation4], 30720  }
  0x16   :  { %3629 = vsyncadd [#allocation4], 4294936576  ;;  %vm91_vm0 = vcmask 1043456   ;;  %vm84_vm1 = vcmask 31744   ;;  %s4225_s29 = sld [smem:[#allocation6_spill]]  ;;  %v82_v2 = vld [vmem:[%s4205_s3] sm:$0xff] }
  0x17   :  { %v83_v3 = vld [vmem:[%s4205_s3 + $0x8] sm:$0xff]  ;;  %2767 = vmatprep.mubr.msk.f32.mxu0 %vm84_vm1, %v82_v2  ;;  %s4226_s30 = sld [smem:[#allocation7_spill]]  ;;  %v256_v5 = vld [vmem:[%s4207_s5] sm:$0xff]  ;;  %vm258_vm2 = vcmask 64512   ;;  %v342_v11 = vld [vmem:[%s4208_s6 + $0x10] sm:$0xff]  ;;  %v3633_v27 = vmov 0  }
  0x18   :  { %v340_v6 = vld [vmem:[%s4208_s6] sm:$0xff]  ;;  %v341_v7 = vld [vmem:[%s4208_s6 + $0x8] sm:$0xff]  ;;  %v343_v12 = vld [vmem:[%s4208_s6 + $0x18] sm:$0xff]  ;;  %3604 = vset.pattern.permute.xlu0 %v3633_v27  ;;  %3605 = vset.pattern.permute.xlu1 %v3633_v27  ;;  %vm174_vm3 = vcmask 261120   ;;  %vm348_vm4 = vcmask 523264   ;;  %vm3635_vm7 = vmmov 0  }
  0x19   :  { %v170_v8 = vld [vmem:[%s4206_s4] sm:$0xff]  ;;  %v3151_v9 = vpack.c.bf16 %v341_v7, %v340_v6  ;;  %v171_v10 = vld [vmem:[%s4206_s4 + $0x8] sm:$0xff]  ;;  %v172_v15 = vld [vmem:[%s4206_s4 + $0x10] sm:$0xff]  ;;  %v3155_v17 = vpack.c.bf16 %v343_v12, %v342_v11  ;;  %vm1687_vm10 = vcmask 130048   ;;  %vm2066_vm11 = vcmask 60416  }
  0x1a   :  { %v257_v13 = vld [vmem:[%s4207_s5 + $0x8] sm:$0xff]  ;;  %v3143_v14 = vpack.c.bf16 %v171_v10, %v170_v8  ;;  %v173_v16 = vld [vmem:[%s4206_s4 + $0x18] sm:$0xff]  ;;  %v344_v19 = vld [vmem:[%s4208_s6 + $0x20] sm:$0xff] }
  0x1b   :  { %v3147_v18 = vpack.c.bf16 %v173_v16, %v172_v15  ;;  %v345_v20 = vld [vmem:[%s4208_s6 + $0x28] sm:$0xff]  ;;  %v346_v22 = vld [vmem:[%s4208_s6 + $0x30] sm:$0xff]  ;;  %v347_v23 = vld [vmem:[%s4208_s6 + $0x38] sm:$0xff] }
  0x1c   :  { %v78_v1 = vld [vmem:[%s4225_s29] sm:$0xf]  ;;  %3144 = vmatprep.subr.bf16.mxu1 %v3143_v14  ;;  %v3159_v21 = vpack.c.bf16 %v345_v20, %v344_v19  ;;  %v3163_v24 = vpack.c.bf16 %v347_v23, %v346_v22  ;;  %v75_v29 = vld [vmem:[%s4217_s15 + $0x8] sm:$0xff]  ;;  %v484_v39 = vld [vmem:[#allocation3 + $0x90] sm:$0xff] }
  0x1d   :  { %2765 = vmatprep.subr.msk.mxu0 %vm91_vm0, %v78_v1  ;;  %v79_v4 = vld [vmem:[%s4226_s30] sm:$0xff]  ;;  %3146 = vmatpush3.bf16.msra.mxu1 %v3143_v14  ;;  %v483_v30 = vld [vmem:[#allocation3 + $0x88] sm:$0xff]  ;;  %v468_v45 = vld [vmem:[#allocation3 + $0x10] sm:$0xff]  ;;  %s4227_s30 = sld [smem:[#allocation8_spill]] }
  0x1e   :  { %2766 = vmatpush3.msk.msra.mxu0 %vm91_vm0, %v78_v1  ;;  %3148 = vmatprep.subr.bf16.mxu1 %v3147_v18  ;;  %v74_v25 = vld [vmem:[%s4217_s15] sm:$0xff]  ;;  %v77_v31 = vld [vmem:[%s4218_s16 + $0x8] sm:$0xff]  ;;  %v500_v47 = vld [vmem:[#allocation3 + $0x110] sm:$0xff] }
  0x1f   :  { %2768 = vmatmul.mubr.msk.f32.vlgmr.msra.gmra.mrb[0].mxu0 %vm84_vm1, %v83_v3  ;;  %2781 = vmatprep.subr.mxu0 %v79_v4  ;;  %v76_v26 = vld [vmem:[%s4218_s16] sm:$0xff]  ;;  %v499_v34 = vld [vmem:[#allocation3 + $0x108] sm:$0xff]  ;;  %v488_v60 = vld [vmem:[#allocation3 + $0xb0] sm:$0xff] }
  0x20   :  { %2782 = vmatpush3.msra.mxu0 %v79_v4  ;;  %2783 = vmatprep.mubr.msk.f32.mxu0 %vm258_vm2, %v256_v5  ;;  %v482_v28 = vld [vmem:[#allocation3 + $0x80] sm:$0xff]  ;;  %v2350_v36 = vld [vmem:[#allocation2] ss:$0 sm:$0xff]  ;;  %v467_v38 = vld [vmem:[#allocation3 + $0x8] sm:$0xff] }
  0x21   :  { %3152 = vmatprep.subr.bf16.mxu0 %v3151_v9  ;;  %3150 = vmatpush3.bf16.msra.mxu1 %v3147_v18  ;;  %v3167_v32 = vpack.c.bf16 %v483_v30, %v482_v28  ;;  %v498_v33 = vld [vmem:[#allocation3 + $0x100] sm:$0xff]  ;;  %v485_v40 = vld [vmem:[#allocation3 + $0x98] sm:$0xff]  ;;  %v487_v50 = vld [vmem:[#allocation3 + $0xa8] sm:$0xff] }
  0x22   :  { %439 = vperm.xlu0 %3604, %v74_v25   ;;  %456 = vperm.xlu1 %3605, %v76_v26   ;;  %v3199_v35 = vpack.c.bf16 %v499_v34, %v498_v33  ;;  %v466_v37 = vld [vmem:[#allocation3] sm:$0xff]  ;;  %v3171_v44 = vpack.c.bf16 %v485_v40, %v484_v39  ;;  %v469_v46 = vld [vmem:[#allocation3 + $0x18] sm:$0xff]  ;;  %v471_v57 = vld [vmem:[#allocation3 + $0x28] sm:$0xff] }
  0x23   :  { %2784 = vmatmul.mubr.msk.f32.vlgmr.msra.gmra.mrb[2].mxu0 %vm258_vm2, %v257_v13  ;;  %3168 = vmatprep.subr.bf16.mxu1 %v3167_v32  ;;  %v3169_v42 = vpack.c.bf16 %v467_v38, %v466_v37  ;;  %v501_v48 = vld [vmem:[#allocation3 + $0x118] sm:$0xff]  ;;  %v486_v49 = vld [vmem:[#allocation3 + $0xa0] sm:$0xff]  ;;  %v3173_v52 = vpack.c.bf16 %v469_v46, %v468_v45  ;;  %v503_v59 = vld [vmem:[#allocation3 + $0x128] sm:$0xff] }
  0x24   :  { %3154 = vmatpush3.bf16.msra.mxu0 %v3151_v9  ;;  %v3203_v54 = vpack.c.bf16 %v501_v48, %v500_v47  ;;  %v3175_v55 = vpack.c.bf16 %v487_v50, %v486_v49  ;;  %v470_v56 = vld [vmem:[#allocation3 + $0x20] sm:$0xff]  ;;  %v489_v61 = vld [vmem:[#allocation3 + $0xb8] sm:$0xff]  ;;  %v472_v1 = vld [vmem:[#allocation3 + $0x30] sm:$0xff]  ;;  %v432_v49 = vlaneseq }
  0x25   :  { %3156 = vmatprep.subr.bf16.mxu0 %v3155_v17  ;;  %v502_v58 = vld [vmem:[#allocation3 + $0x120] sm:$0xff]  ;;  %v3177_v62 = vpack.c.bf16 %v471_v57, %v470_v56  ;;  %v3179_v0 = vpack.c.bf16 %v489_v61, %v488_v60  ;;  %v473_v2 = vld [vmem:[#allocation3 + $0x38] sm:$0xff]  ;;  %v504_v3 = vld [vmem:[#allocation3 + $0x130] sm:$0xff] }
  0x26   :  { %444 = vperm.xlu0 %3604, %v75_v29   ;;  %461 = vperm.xlu1 %3605, %v77_v31   ;;  %v3207_v63 = vpack.c.bf16 %v503_v59, %v502_v58  ;;  %v505_v4 = vld [vmem:[#allocation3 + $0x138] sm:$0xff]  ;;  %v490_v5 = vld [vmem:[#allocation3 + $0xc0] sm:$0xff]  ;;  %v491_v6 = vld [vmem:[#allocation3 + $0xc8] sm:$0xff]  ;;  %v3181_v7 = vpack.c.bf16 %v473_v2, %v472_v1 }
  0x27   :  { %v3211_v8 = vpack.c.bf16 %v505_v4, %v504_v3  ;;  %v3183_v9 = vpack.c.bf16 %v491_v6, %v490_v5  ;;  %v474_v10 = vld [vmem:[#allocation3 + $0x40] sm:$0xff]  ;;  %v475_v11 = vld [vmem:[#allocation3 + $0x48] sm:$0xff]  ;;  %v492_v14 = vld [vmem:[#allocation3 + $0xd0] sm:$0xff] }
  0x28   :  { %3158 = vmatpush3.bf16.msra.mxu0 %v3155_v17  ;;  %v506_v12 = vld [vmem:[#allocation3 + $0x140] sm:$0xff]  ;;  %v507_v13 = vld [vmem:[#allocation3 + $0x148] sm:$0xff]  ;;  %v493_v15 = vld [vmem:[#allocation3 + $0xd8] sm:$0xff]  ;;  %v3185_v16 = vpack.c.bf16 %v475_v11, %v474_v10 }
  0x29   :  { %3160 = vmatprep.subr.bf16.mxu0 %v3159_v21  ;;  %v3215_v17 = vpack.c.bf16 %v507_v13, %v506_v12  ;;  %v3187_v18 = vpack.c.bf16 %v493_v15, %v492_v14  ;;  %v476_v19 = vld [vmem:[#allocation3 + $0x50] sm:$0xff]  ;;  %v477_v20 = vld [vmem:[#allocation3 + $0x58] sm:$0xff]  ;;  %v494_v23 = vld [vmem:[#allocation3 + $0xe0] sm:$0xff] }
  0x2a   :  { %1588 = vperm.xlu0 %3604, %v2350_v36   ;;  %v509_v22 = vld [vmem:[#allocation3 + $0x158] sm:$0xff]  ;;  %v3189_v25 = vpack.c.bf16 %v477_v20, %v476_v19  ;;  %v478_v28 = vld [vmem:[#allocation3 + $0x60] sm:$0xff]  ;;  %v479_v29 = vld [vmem:[#allocation3 + $0x68] sm:$0xff] }
  0x2b   :  { %v510_v30 = vld [vmem:[#allocation3 + $0x160] sm:$0xff]  ;;  %v511_v31 = vld [vmem:[#allocation3 + $0x168] sm:$0xff]  ;;  %v3193_v32 = vpack.c.bf16 %v479_v29, %v478_v28  ;;  %v496_v34 = vld [vmem:[#allocation3 + $0xf0] sm:$0xff] }
  0x2c   :  { %3162 = vmatpush3.bf16.msra.mxu0 %v3159_v21  ;;  %v508_v21 = vld [vmem:[#allocation3 + $0x150] sm:$0xff]  ;;  %v3223_v33 = vpack.c.bf16 %v511_v31, %v510_v30  ;;  %v481_v38 = vld [vmem:[#allocation3 + $0x78] sm:$0xff]  ;;  %v718_v46 = vld [vmem:[#allocation3 + $0x280] sm:$0xff] }
  0x2d   :  { %3164 = vmatprep.subr.bf16.mxu0 %v3163_v24  ;;  %v3219_v26 = vpack.c.bf16 %v509_v22, %v508_v21  ;;  %v480_v37 = vld [vmem:[#allocation3 + $0x70] sm:$0xff]  ;;  %v719_v47 = vld [vmem:[#allocation3 + $0x288] sm:$0xff]  ;;  %v706_v19 = vld [vmem:[#allocation3 + $0x220] sm:$0xff] }
  0x2e   :  { %v512_v39 = vld [vmem:[#allocation3 + $0x170] sm:$0xff]  ;;  %v3197_v40 = vpack.c.bf16 %v481_v38, %v480_v37  ;;  %v3263_v48 = vpack.c.bf16 %v719_v47, %v718_v46  ;;  %v707_v20 = vld [vmem:[#allocation3 + $0x228] sm:$0xff] }
  0x2f   :  { %v688_v1 = vld [vmem:[#allocation3 + $0x190] sm:$0xff]  ;;  %v723_v28 = vld [vmem:[#allocation3 + $0x2a8] sm:$0xff]  ;;  %v3239_v31 = vpack.c.bf16 %v707_v20, %v706_v19  ;;  %v701_v20 = vld [vmem:[#allocation3 + $0x1f8] sm:$0xff] }
  0x30   :  { %3166 = vmatpush3.bf16.msra.mxu0 %v3163_v24  ;;  %v495_v24 = vld [vmem:[#allocation3 + $0xe8] sm:$0xff]  ;;  %v700_v19 = vld [vmem:[#allocation3 + $0x1f0] sm:$0xff] }
  0x31   :  { %3200 = vmatprep.subr.bf16.mxu0 %v3199_v35  ;;  %v3191_v27 = vpack.c.bf16 %v495_v24, %v494_v23 }
  0xa1   :  { %v3819_v50 = vpop.permute.xlu1 %456  ;;  %v3825_v58 = vpop.permute.xlu0 %439 }
  0xa5   :  { %v3827_v61 = vpop.permute.xlu1 %461  ;;  %v3844_v23 = vpop.permute.xlu0 %444 }
  0xf2   :  { %v2769_v41 = vpop.f32.mrb[0].mxu0 }
  0xf3   :  { %v161_v43 = vpop.f32.mrb[1].mxu0 }
  0xf4   :  { %2778 = vmatprep.mubr.msk.f32.mxu1 %vm174_vm3, %v161_v43  ;;  %v702_v43 = vld [vmem:[#allocation3 + $0x200] sm:$0xff] }
  0xf5   :  { %2779 = vmatmul.mubr.msk.f32.vlgmr.msra.gmra.mrb[0].mxu1 %vm174_vm3, %v2769_v41  ;;  %v513_v41 = vld [vmem:[#allocation3 + $0x178] sm:$0xff] }
  0xf6   :  { %v2785_v51 = vpop.f32.mrb[2].mxu0  ;;  %3170 = vmatpush3.bf16.msra.mxu1 %v3169_v42  ;;  %v3227_v42 = vpack.c.bf16 %v513_v41, %v512_v39  ;;  %v724_v39 = vld [vmem:[#allocation3 + $0x2b0] sm:$0xff] }
  0xf7   :  { %v331_v53 = vpop.f32.mrb[3].mxu0  ;;  %3172 = vmatprep.subr.bf16.mxu1 %v3171_v44  ;;  %v703_v44 = vld [vmem:[#allocation3 + $0x208] sm:$0xff] }
  0xf8   :  { %2802 = vmatprep.mubr.msk.f32.mxu0 %vm348_vm4, %v331_v53  ;;  %v3231_v45 = vpack.c.bf16 %v703_v44, %v702_v43  ;;  %v686_v53 = vld [vmem:[#allocation3 + $0x180] sm:$0xff]  ;;  %v693_v43 = vld [vmem:[#allocation3 + $0x1b8] sm:$0xff] }
  0xf9   :  { %2803 = vmatmul.mubr.msk.f32.vlgmr.msra.gmra.mrb[4].mxu0 %vm348_vm4, %v2785_v51  ;;  %v3821_v51 = vshrl.u32 %v432_v49, 7  ;;  %v710_v44 = vld [vmem:[#allocation3 + $0x240] sm:$0xff]  ;;  %v727_v49 = vld [vmem:[#allocation3 + $0x2c8] sm:$0xff] }
  0xfa   :  { %3202 = vmatpush3.bf16.msra.mxu0 %v3199_v35  ;;  %3174 = vmatpush3.bf16.msra.mxu1 %v3173_v52  ;;  %v497_v35 = vld [vmem:[#allocation3 + $0xf8] sm:$0xff] }
  0xfb   :  { %3204 = vmatprep.subr.bf16.mxu0 %v3203_v54  ;;  %3176 = vmatprep.subr.bf16.mxu1 %v3175_v55  ;;  %v3195_v36 = vpack.c.bf16 %v497_v35, %v496_v34  ;;  %vm434_vm5 = vcmp.lt.s32.totalorder %v3821_v51, 1  ;;  %vm451_vm6 = vcmp.lt.s32.totalorder %v3821_v51, 7  ;;  %v708_v34 = vld [vmem:[#allocation3 + $0x230] sm:$0xff]  ;;  %v709_v35 = vld [vmem:[#allocation3 + $0x238] sm:$0xff]  ;;  %vm1674_vm8 = vcmp.lt.s32.totalorder %v3821_v51, 6 }
  0xfc   :  { %v3243_v41 = vpack.c.bf16 %v709_v35, %v708_v34  ;;  %v928_v34 = vld [vmem:[#allocation3 + $0x398] sm:$0xff]  ;;  %vm1679_vm9 = vcmp.lt.s32.totalorder %v3821_v51, 5 }
  0xfe   :  { %3206 = vmatpush3.bf16.msra.mxu0 %v3203_v54  ;;  %3178 = vmatpush3.bf16.msra.mxu1 %v3177_v62  ;;  %v687_v54 = vld [vmem:[#allocation3 + $0x188] sm:$0xff] }
  0xff   :  { %3208 = vmatprep.subr.bf16.mxu0 %v3207_v63  ;;  %3180 = vmatprep.subr.bf16.mxu1 %v3179_v0  ;;  %v3233_v62 = vpack.c.bf16 %v687_v54, %v686_v53  ;;  %v705_v0 = vld [vmem:[#allocation3 + $0x218] sm:$0xff]  ;;  %v694_v53 = vld [vmem:[#allocation3 + $0x1c0] sm:$0xff]  ;;  %v695_v54 = vld [vmem:[#allocation3 + $0x1c8] sm:$0xff] }
 0x102   :  { %3210 = vmatpush3.bf16.msra.mxu0 %v3207_v63  ;;  %3182 = vmatpush3.bf16.msra.mxu1 %v3181_v7  ;;  %v704_v63 = vld [vmem:[#allocation3 + $0x210] sm:$0xff]  ;;  %v689_v7 = vld [vmem:[#allocation3 + $0x198] sm:$0xff] }
 0x103   :  { %3212 = vmatprep.subr.bf16.mxu0 %v3211_v8  ;;  %3184 = vmatprep.subr.bf16.mxu1 %v3183_v9  ;;  %v721_v9 = vld [vmem:[#allocation3 + $0x298] sm:$0xff]  ;;  %v3237_v21 = vpack.c.bf16 %v689_v7, %v688_v1  ;;  %v730_v7 = vld [vmem:[#allocation3 + $0x2e0] sm:$0xff] }
 0x104   :  { %v697_v1 = vld [vmem:[#allocation3 + $0x1d8] sm:$0xff] }
 0x106   :  { %3214 = vmatpush3.bf16.msra.mxu0 %v3211_v8  ;;  %3186 = vmatpush3.bf16.msra.mxu1 %v3185_v16  ;;  %v720_v8 = vld [vmem:[#allocation3 + $0x290] sm:$0xff] }
 0x107   :  { %3216 = vmatprep.subr.bf16.mxu0 %v3215_v17  ;;  %3188 = vmatprep.subr.bf16.mxu1 %v3187_v18  ;;  %v3235_v18 = vpack.c.bf16 %v705_v0, %v704_v63  ;;  %v3267_v22 = vpack.c.bf16 %v721_v9, %v720_v8  ;;  %v696_v0 = vld [vmem:[#allocation3 + $0x1d0] sm:$0xff]  ;;  %v731_v8 = vld [vmem:[#allocation3 + $0x2e8] sm:$0xff] }
 0x10a   :  { %3218 = vmatpush3.bf16.msra.mxu0 %v3215_v17  ;;  %3190 = vmatpush3.bf16.msra.mxu1 %v3189_v25 }
 0x10b   :  { %3220 = vmatprep.subr.bf16.mxu0 %v3219_v26  ;;  %3192 = vmatprep.subr.bf16.mxu1 %v3191_v27  ;;  %v722_v27 = vld [vmem:[#allocation3 + $0x2a0] sm:$0xff] }
 0x10c   :  { %v3271_v37 = vpack.c.bf16 %v723_v28, %v722_v27  ;;  %v3261_v27 = vpack.c.bf16 %v701_v20, %v700_v19  ;;  %v941_v28 = vld [vmem:[#allocation3 + $0x400] sm:$0xff]  ;;  %v952_v19 = vld [vmem:[#allocation3 + $0x458] sm:$0xff] }
 0x10e   :  { %3222 = vmatpush3.bf16.msra.mxu0 %v3219_v26  ;;  %3194 = vmatpush3.bf16.msra.mxu1 %v3193_v32  ;;  %v690_v32 = vld [vmem:[#allocation3 + $0x1a0] sm:$0xff] }
 0x10f   :  { %3224 = vmatprep.subr.bf16.mxu0 %v3223_v33  ;;  %3196 = vmatprep.subr.bf16.mxu1 %v3195_v36 }
 0x112   :  { %3226 = vmatpush3.bf16.msra.mxu0 %v3223_v33  ;;  %3198 = vmatpush3.bf16.msra.mxu1 %v3197_v40  ;;  %v691_v33 = vld [vmem:[#allocation3 + $0x1a8] sm:$0xff]  ;;  %v725_v40 = vld [vmem:[#allocation3 + $0x2b8] sm:$0xff] }
 0x113   :  { %3228 = vmatprep.subr.bf16.mxu0 %v3227_v42  ;;  %3232 = vmatprep.subr.bf16.mxu1 %v3231_v45  ;;  %v3241_v38 = vpack.c.bf16 %v691_v33, %v690_v32  ;;  %v711_v45 = vld [vmem:[#allocation3 + $0x248] sm:$0xff]  ;;  %v3275_v46 = vpack.c.bf16 %v725_v40, %v724_v39  ;;  %v927_v33 = vld [vmem:[#allocation3 + $0x390] sm:$0xff]  ;;  %v944_v39 = vld [vmem:[#allocation3 + $0x418] sm:$0xff] }
 0x114   :  { %v910_v32 = vld [vmem:[#allocation3 + $0x308] sm:$0xff] }
 0x116   :  { %3230 = vmatpush3.bf16.msra.mxu0 %v3227_v42  ;;  %v692_v42 = vld [vmem:[#allocation3 + $0x1b0] sm:$0xff] }
 0x117   :  { %3264 = vmatprep.subr.bf16.mxu0 %v3263_v48  ;;  %v3245_v47 = vpack.c.bf16 %v693_v43, %v692_v42  ;;  %v911_v42 = vld [vmem:[#allocation3 + $0x310] sm:$0xff]  ;;  %v912_v43 = vld [vmem:[#allocation3 + $0x318] sm:$0xff] }
 0x1c8   :  { %v2780_v52 = vpop.f32.mrb[0].mxu1 }
 0x1c9   :  { %v431_v55 = vrot.slane %v2780_v52, 7  ;;  %v450_v56 = vrot.slane %v2780_v52, 1  ;;  %v247_v57 = vpop.f32.mrb[1].mxu1 }
 0x1ca   :  { %v430_v59 = vrot.slane %v247_v57, 7  ;;  %v449_v60 = vrot.slane %v247_v57, 1  ;;  %585 = vmatprep.mubr.f32.mxu1 %v247_v57 }
 0x1cc   :  { %v436_v2 = vsel %vm434_vm5, %v431_v55, %v430_v59  ;;  %v3831_v3 = vpop.f32.mrb[4].mxu0  ;;  %v453_v4 = vsel %vm451_vm6, %v450_v56, %v449_v60  ;;  %v452_v5 = vsel %vm451_vm6, %v449_v60, %v450_v56  ;;  %v435_v6 = vsel %vm434_vm5, %v430_v59, %v431_v55  ;;  %v712_v55 = vld [vmem:[#allocation3 + $0x250] sm:$0xff]  ;;  %v713_v56 = vld [vmem:[#allocation3 + $0x258] sm:$0xff] }
 0x1cd   :  { %v674_v10 = vrot.slane %v3831_v3, 7  ;;  %v680_v11 = vrot.slane %v3831_v3, 1  ;;  %v465_v12 = vmul.f32 %v3827_v61, %v453_v4  ;;  %v421_v13 = vpop.f32.mrb[5].mxu0  ;;  %v447_v14 = vmul.f32 %v3825_v58, %v436_v2  ;;  %v728_v60 = vld [vmem:[#allocation3 + $0x2d0] sm:$0xff]  ;;  %v714_v2 = vld [vmem:[#allocation3 + $0x260] sm:$0xff]  ;;  %v715_v4 = vld [vmem:[#allocation3 + $0x268] sm:$0xff] }
 0x1ce   :  { %v673_v15 = vrot.slane %v421_v13, 7  ;;  %v679_v16 = vrot.slane %v421_v13, 1  ;;  %v464_v17 = vmul.f32 %v3819_v50, %v452_v5  ;;  %v448_v29 = vmul.f32 %v3844_v23, %v435_v6 }
 0x1cf   :  { %586 = vmatmul.mubr.f32.vlgmr.msra.gmra.mrb[2].mxu1 %v447_v14  ;;  %v3249_v59 = vpack.c.bf16 %v695_v54, %v694_v53  ;;  %v3251_v63 = vpack.c.bf16 %v713_v56, %v712_v55  ;;  %v3253_v6 = vpack.c.bf16 %v697_v1, %v696_v0  ;;  %v3255_v9 = vpack.c.bf16 %v715_v4, %v714_v2  ;;  %v913_v54 = vld [vmem:[#allocation3 + $0x320] sm:$0xff]  ;;  %v914_v55 = vld [vmem:[#allocation3 + $0x328] sm:$0xff]  ;;  %v948_v0 = vld [vmem:[#allocation3 + $0x438] sm:$0xff] }
 0x1d0   :  { %v3848_v24 = vsel %vm434_vm5, %v674_v10, %v673_v15  ;;  %v3852_v25 = vsel %vm451_vm6, %v680_v11, %v679_v16  ;;  %2837 = vmatprep.mubr.f32.mxu0 %v464_v17  ;;  %3234 = vmatpush3.bf16.msra.mxu1 %v3233_v62  ;;  %v681_v26 = vsel %vm451_vm6, %v679_v16, %v680_v11  ;;  %v729_v62 = vld [vmem:[#allocation3 + $0x2d8] sm:$0xff]  ;;  %v699_v11 = vld [vmem:[#allocation3 + $0x1e8] sm:$0xff]  ;;  %v732_v16 = vld [vmem:[#allocation3 + $0x2f0] sm:$0xff] }
 0x1d1   :  { %590 = vmatprep.mubr.f32.mxu1 %v2780_v52  ;;  %2838 = vmatmul.mubr.f32.vlgmr.msra.gmra.mrb[6].mxu0 %v465_v12  ;;  %v683_v30 = vmul.f32 %v681_v26, %v3819_v50  ;;  %v3860_v36 = vsel %vm434_vm5, %v673_v15, %v674_v10  ;;  %v3247_v52 = vpack.c.bf16 %v711_v45, %v710_v44  ;;  %v698_v10 = vld [vmem:[#allocation3 + $0x1e0] sm:$0xff]  ;;  %v716_v12 = vld [vmem:[#allocation3 + $0x270] sm:$0xff]  ;;  %v733_v17 = vld [vmem:[#allocation3 + $0x2f8] sm:$0xff] }
 0x1d2   :  { %3266 = vmatpush3.bf16.msra.mxu0 %v3263_v48  ;;  %3236 = vmatprep.subr.bf16.mxu1 %v3235_v18  ;;  %v726_v48 = vld [vmem:[#allocation3 + $0x2c0] sm:$0xff]  ;;  %v3283_v5 = vpack.c.bf16 %v729_v62, %v728_v60  ;;  %v3287_v14 = vpack.c.bf16 %v731_v8, %v730_v7  ;;  %v3257_v15 = vpack.c.bf16 %v699_v11, %v698_v10  ;;  %v930_v45 = vld [vmem:[#allocation3 + $0x3a8] sm:$0xff]  ;;  %v915_v60 = vld [vmem:[#allocation3 + $0x330] sm:$0xff] }
 0x1d3   :  { %591 = vmatmul.mubr.f32.gmra.mrb[4].mxu1 %v448_v29  ;;  %3268 = vmatprep.subr.bf16.mxu0 %v3267_v22  ;;  %v3279_v57 = vpack.c.bf16 %v727_v49, %v726_v48  ;;  %v3291_v26 = vpack.c.bf16 %v733_v17, %v732_v16  ;;  %v942_v29 = vld [vmem:[#allocation3 + $0x408] sm:$0xff]  ;;  %v677_v40 = vmul.f32 %v3848_v24, %v3825_v58  ;;  %v929_v44 = vld [vmem:[#allocation3 + $0x3a0] sm:$0xff]  ;;  %v947_v62 = vld [vmem:[#allocation3 + $0x430] sm:$0xff] }
 0x1d4   :  { %3238 = vmatpush3.bf16.msra.mxu1 %v3237_v21  ;;  %2872 = vmatprep.mubr.f32.mxu0 %v683_v30  ;;  %v925_v21 = vld [vmem:[#allocation3 + $0x380] sm:$0xff]  ;;  %v3327_v35 = vpack.c.bf16 %v942_v29, %v941_v28  ;;  %v3301_v48 = vpack.c.bf16 %v912_v43, %v911_v42  ;;  %v678_v24 = vmul.f32 %v3860_v36, %v3844_v23  ;;  %v916_v36 = vld [vmem:[#allocation3 + $0x338] sm:$0xff]  ;;  %v934_v4 = vld [vmem:[#allocation3 + $0x3c8] sm:$0xff] }
 0x1d5   :  { %3240 = vmatprep.subr.bf16.mxu1 %v3239_v31  ;;  %806 = vmatprep.mubr.f32.mxu1 %v421_v13  ;;  %v717_v13 = vld [vmem:[#allocation3 + $0x278] sm:$0xff]  ;;  %v909_v31 = vld [vmem:[#allocation3 + $0x300] sm:$0xff]  ;;  %v3303_v53 = vpack.c.bf16 %v930_v45, %v929_v44  ;;  %v3305_v56 = vpack.c.bf16 %v914_v55, %v913_v54  ;;  %v3339_v1 = vpack.c.bf16 %v948_v0, %v947_v62  ;;  %v918_v7 = vld [vmem:[#allocation3 + $0x348] sm:$0xff] }
 0x1d6   :  { %3270 = vmatpush3.bf16.msra.mxu0 %v3267_v22  ;;  %v3259_v18 = vpack.c.bf16 %v717_v13, %v716_v12  ;;  %v926_v22 = vld [vmem:[#allocation3 + $0x388] sm:$0xff]  ;;  %v945_v49 = vld [vmem:[#allocation3 + $0x420] sm:$0xff]  ;;  %v935_v12 = vld [vmem:[#allocation3 + $0x3d0] sm:$0xff] }
 0x1d7   :  { %3272 = vmatprep.subr.bf16.mxu0 %v3271_v37  ;;  %v3295_v30 = vpack.c.bf16 %v926_v22, %v925_v21  ;;  %v933_v2 = vld [vmem:[#allocation3 + $0x3c0] sm:$0xff]  ;;  %v950_v10 = vld [vmem:[#allocation3 + $0x448] sm:$0xff]  ;;  %v936_v13 = vld [vmem:[#allocation3 + $0x3d8] sm:$0xff] }
 0x1d8   :  { %3242 = vmatpush3.bf16.msra.mxu1 %v3241_v38  ;;  %v943_v38 = vld [vmem:[#allocation3 + $0x410] sm:$0xff]  ;;  %v949_v8 = vld [vmem:[#allocation3 + $0x440] sm:$0xff]  ;;  %v920_v16 = vld [vmem:[#allocation3 + $0x358] sm:$0xff] }
 0x1d9   :  { %3244 = vmatprep.subr.bf16.mxu1 %v3243_v41  ;;  %v3299_v41 = vpack.c.bf16 %v928_v34, %v927_v33  ;;  %v3343_v11 = vpack.c.bf16 %v950_v10, %v949_v8  ;;  %v937_v21 = vld [vmem:[#allocation3 + $0x3e0] sm:$0xff]  ;;  %v938_v22 = vld [vmem:[#allocation3 + $0x3e8] sm:$0xff]  ;;  %v939_v33 = vld [vmem:[#allocation3 + $0x3f0] sm:$0xff] }
 0x1da   :  { %3274 = vmatpush3.bf16.msra.mxu0 %v3271_v37  ;;  %v3297_v37 = vpack.c.bf16 %v910_v32, %v909_v31  ;;  %v922_v28 = vld [vmem:[#allocation3 + $0x368] sm:$0xff]  ;;  %v953_v29 = vld [vmem:[#allocation3 + $0x460] sm:$0xff]  ;;  %v940_v34 = vld [vmem:[#allocation3 + $0x3f8] sm:$0xff] }
 0x1db   :  { %3276 = vmatprep.subr.bf16.mxu0 %v3275_v46  ;;  %v954_v31 = vld [vmem:[#allocation3 + $0x468] sm:$0xff]  ;;  %v1148_v42 = vld [vmem:[#allocation3 + $0x500] sm:$0xff] }
 0x1dc   :  { %3246 = vmatpush3.bf16.msra.mxu1 %v3245_v47  ;;  %v3331_v47 = vpack.c.bf16 %v944_v39, %v943_v38  ;;  %v3351_v32 = vpack.c.bf16 %v954_v31, %v953_v29  ;;  %v924_v38 = vld [vmem:[#allocation3 + $0x378] sm:$0xff]  ;;  %v955_v39 = vld [vmem:[#allocation3 + $0x470] sm:$0xff]  ;;  %v1149_v43 = vld [vmem:[#allocation3 + $0x508] sm:$0xff] }
 0x1dd   :  { %3248 = vmatprep.subr.bf16.mxu1 %v3247_v52  ;;  %v946_v52 = vld [vmem:[#allocation3 + $0x428] sm:$0xff]  ;;  %v3359_v45 = vpack.c.bf16 %v1149_v43, %v1148_v42  ;;  %v1152_v29 = vld [vmem:[#allocation3 + $0x520] sm:$0xff] }
 0x1de   :  { %3278 = vmatpush3.bf16.msra.mxu0 %v3275_v46  ;;  %v684_v46 = vmul.f32 %v3852_v25, %v3827_v61  ;;  %v3335_v25 = vpack.c.bf16 %v946_v52, %v945_v49 }
 0x1df   :  { %3280 = vmatprep.subr.bf16.mxu0 %v3279_v57 }
 0x1e0   :  { %3250 = vmatpush3.bf16.msra.mxu1 %v3249_v59 }
 0x1e1   :  { %3252 = vmatprep.subr.bf16.mxu1 %v3251_v63  ;;  %v3309_v63 = vpack.c.bf16 %v916_v36, %v915_v60  ;;  %v80_v60 = vld [vmem:[%s4227_s30] sm:$0xff] }
 0x1e2   :  { %3282 = vmatpush3.bf16.msra.mxu0 %v3279_v57  ;;  %v932_v57 = vld [vmem:[#allocation3 + $0x3b8] sm:$0xff] }
 0x1e3   :  { %3284 = vmatprep.subr.bf16.mxu0 %v3283_v5 }
 0x1e4   :  { %3254 = vmatpush3.bf16.msra.mxu1 %v3253_v6  ;;  %v917_v6 = vld [vmem:[#allocation3 + $0x340] sm:$0xff] }
 0x1e5   :  { %3256 = vmatprep.subr.bf16.mxu1 %v3255_v9  ;;  %v3313_v9 = vpack.c.bf16 %v918_v7, %v917_v6  ;;  %v1133_v6 = vld [vmem:[#allocation3 + $0x488] sm:$0xff] }
 0x1e6   :  { %3286 = vmatpush3.bf16.msra.mxu0 %v3283_v5  ;;  %v3311_v5 = vpack.c.bf16 %v934_v4, %v933_v2 }
 0x1e7   :  { %3288 = vmatprep.subr.bf16.mxu0 %v3287_v14 }
 0x1e8   :  { %3258 = vmatpush3.bf16.msra.mxu1 %v3257_v15  ;;  %v919_v15 = vld [vmem:[#allocation3 + $0x350] sm:$0xff] }
 0x1e9   :  { %3260 = vmatprep.subr.bf16.mxu1 %v3259_v18  ;;  %v3317_v17 = vpack.c.bf16 %v920_v16, %v919_v15  ;;  %v951_v18 = vld [vmem:[#allocation3 + $0x450] sm:$0xff] }
 0x1ea   :  { %3290 = vmatpush3.bf16.msra.mxu0 %v3287_v14  ;;  %v3315_v14 = vpack.c.bf16 %v936_v13, %v935_v12  ;;  %v3347_v20 = vpack.c.bf16 %v952_v19, %v951_v18  ;;  %v1151_v12 = vld [vmem:[#allocation3 + $0x518] sm:$0xff] }
 0x1eb   :  { %3292 = vmatprep.subr.bf16.mxu0 %v3291_v26  ;;  %v1167_v18 = vld [vmem:[#allocation3 + $0x598] sm:$0xff] }
 0x1ec   :  { %3262 = vmatpush3.bf16.msra.mxu1 %v3261_v27  ;;  %v921_v27 = vld [vmem:[#allocation3 + $0x360] sm:$0xff] }
 0x1ed   :  { %3296 = vmatprep.subr.bf16.mxu1 %v3295_v30  ;;  %v3321_v30 = vpack.c.bf16 %v922_v28, %v921_v27  ;;  %v1135_v27 = vld [vmem:[#allocation3 + $0x498] sm:$0xff] }
 0x1ee   :  { %3294 = vmatpush3.bf16.msra.mxu0 %v3291_v26  ;;  %v3319_v26 = vpack.c.bf16 %v938_v22, %v937_v21 }
 0x1ef   :  { %807 = vmatmul.mubr.f32.vlgmr.msra.gmra.mrb[6].mxu1 %v677_v40  ;;  %3328 = vmatprep.subr.bf16.mxu0 %v3327_v35 }
 0x1f0   :  { %811 = vmatprep.mubr.f32.mxu1 %v3831_v3  ;;  %3298 = vmatpush3.bf16.msra.mxu1 %v3297_v37  ;;  %v931_v3 = vld [vmem:[#allocation3 + $0x3b0] sm:$0xff] }
 0x1f1   :  { %2873 = vmatmul.mubr.f32.vlgmr.msra.gmra.mrb[8].mxu0 %v684_v46  ;;  %3300 = vmatprep.subr.bf16.mxu1 %v3299_v41  ;;  %v3307_v59 = vpack.c.bf16 %v932_v57, %v931_v3  ;;  %v923_v37 = vld [vmem:[#allocation3 + $0x370] sm:$0xff]  ;;  %v956_v41 = vld [vmem:[#allocation3 + $0x478] sm:$0xff]  ;;  %v1164_v46 = vld [vmem:[#allocation3 + $0x580] sm:$0xff] }
 0x1f2   :  { %3330 = vmatpush3.bf16.msra.mxu0 %v3327_v35  ;;  %v3323_v35 = vpack.c.bf16 %v940_v34, %v939_v33  ;;  %v3325_v40 = vpack.c.bf16 %v924_v38, %v923_v37  ;;  %v3355_v44 = vpack.c.bf16 %v956_v41, %v955_v39  ;;  %v1168_v33 = vld [vmem:[#allocation3 + $0x5a0] sm:$0xff]  ;;  %v1169_v34 = vld [vmem:[#allocation3 + $0x5a8] sm:$0xff]  ;;  %v1155_v41 = vld [vmem:[#allocation3 + $0x538] sm:$0xff] }
 0x1f3   :  { %812 = vmatmul.mubr.f32.gmra.mrb[8].mxu1 %v678_v24  ;;  %3332 = vmatprep.subr.bf16.mxu0 %v3331_v47  ;;  %v2341_v24 = vld [vmem:[%s4210_s8] ss:$0 sm:$0xff]  ;;  %v1136_v38 = vld [vmem:[#allocation3 + $0x4a0] sm:$0xff]  ;;  %v1137_v39 = vld [vmem:[#allocation3 + $0x4a8] sm:$0xff]  ;;  %v3399_v42 = vpack.c.bf16 %v1169_v34, %v1168_v33 }
 0x1f4   :  { %3302 = vmatpush3.bf16.msra.mxu1 %v3301_v48  ;;  %v3369_v43 = vpack.c.bf16 %v1137_v39, %v1136_v38  ;;  %v1178_v38 = vld [vmem:[#allocation3 + $0x5f0] sm:$0xff]  ;;  %v1179_v39 = vld [vmem:[#allocation3 + $0x5f8] sm:$0xff] }
 0x1f5   :  { %3304 = vmatprep.subr.bf16.mxu1 %v3303_v53 }
 0x1f6   :  { %3334 = vmatpush3.bf16.msra.mxu0 %v3331_v47  ;;  %v1165_v47 = vld [vmem:[#allocation3 + $0x588] sm:$0xff] }
 0x1f7   :  { %3336 = vmatprep.subr.bf16.mxu0 %v3335_v25  ;;  %v3391_v48 = vpack.c.bf16 %v1165_v47, %v1164_v46  ;;  %v1138_v47 = vld [vmem:[#allocation3 + $0x4b0] sm:$0xff] }
 0x1f8   :  { %3306 = vmatpush3.bf16.msra.mxu1 %v3305_v56 }
 0x1f9   :  { %3308 = vmatprep.subr.bf16.mxu1 %v3307_v59 }
 0x1fa   :  { %3338 = vmatpush3.bf16.msra.mxu0 %v3335_v25 }
 0x1fb   :  { %3340 = vmatprep.subr.bf16.mxu0 %v3339_v1 }
 0x1fc   :  { %3310 = vmatpush3.bf16.msra.mxu1 %v3309_v63 }
 0x1fd   :  { %3312 = vmatprep.subr.bf16.mxu1 %v3311_v5  ;;  %v1132_v5 = vld [vmem:[#allocation3 + $0x480] sm:$0xff] }
 0x1fe   :  { %3342 = vmatpush3.bf16.msra.mxu0 %v3339_v1  ;;  %v81_v1 = vld [vmem:[%s4227_s30 + $0x8] sm:$0xff]  ;;  %v3361_v15 = vpack.c.bf16 %v1133_v6, %v1132_v5  ;;  %v1174_v6 = vld [vmem:[#allocation3 + $0x5d0] sm:$0xff] }
 0x1ff   :  { %3344 = vmatprep.subr.bf16.mxu0 %v3343_v11 }
 0x200   :  { %3314 = vmatpush3.bf16.msra.mxu1 %v3313_v9 }
 0x201   :  { %3316 = vmatprep.subr.bf16.mxu1 %v3315_v14 }
 0x202   :  { %3346 = vmatpush3.bf16.msra.mxu0 %v3343_v11  ;;  %v1150_v11 = vld [vmem:[#allocation3 + $0x510] sm:$0xff] }
 0x203   :  { %3348 = vmatprep.subr.bf16.mxu0 %v3347_v20  ;;  %v3363_v22 = vpack.c.bf16 %v1151_v12, %v1150_v11  ;;  %v1143_v11 = vld [vmem:[#allocation3 + $0x4d8] sm:$0xff] }
 0x204   :  { %3318 = vmatpush3.bf16.msra.mxu1 %v3317_v17  ;;  %v1166_v17 = vld [vmem:[#allocation3 + $0x590] sm:$0xff] }
 0x205   :  { %3320 = vmatprep.subr.bf16.mxu1 %v3319_v26  ;;  %v1134_v26 = vld [vmem:[#allocation3 + $0x490] sm:$0xff]  ;;  %v3395_v31 = vpack.c.bf16 %v1167_v18, %v1166_v17 }
 0x206   :  { %3350 = vmatpush3.bf16.msra.mxu0 %v3347_v20 }
 0x207   :  { %3352 = vmatprep.subr.bf16.mxu0 %v3351_v32 }
 0x208   :  { %3322 = vmatpush3.bf16.msra.mxu1 %v3321_v30  ;;  %v1153_v30 = vld [vmem:[#allocation3 + $0x528] sm:$0xff] }
 0x209   :  { %3324 = vmatprep.subr.bf16.mxu1 %v3323_v35  ;;  %v3367_v37 = vpack.c.bf16 %v1153_v30, %v1152_v29 }
 0x20a   :  { %3354 = vmatpush3.bf16.msra.mxu0 %v3351_v32  ;;  %v3365_v32 = vpack.c.bf16 %v1135_v27, %v1134_v26  ;;  %v1144_v27 = vld [vmem:[#allocation3 + $0x4e0] sm:$0xff] }
 0x20b   :  { %3356 = vmatprep.subr.bf16.mxu0 %v3355_v44 }
 0x20c   :  { %3326 = vmatpush3.bf16.msra.mxu1 %v3325_v40  ;;  %v1154_v40 = vld [vmem:[#allocation3 + $0x530] sm:$0xff] }
 0x20d   :  { %3360 = vmatprep.subr.bf16.mxu1 %v3359_v45  ;;  %v1171_v45 = vld [vmem:[#allocation3 + $0x5b8] sm:$0xff]  ;;  %v3371_v46 = vpack.c.bf16 %v1155_v41, %v1154_v40  ;;  %v1146_v41 = vld [vmem:[#allocation3 + $0x4f0] sm:$0xff] }
 0x20e   :  { %3358 = vmatpush3.bf16.msra.mxu0 %v3355_v44  ;;  %v1170_v44 = vld [vmem:[#allocation3 + $0x5b0] sm:$0xff] }
 0x20f   :  { %3392 = vmatprep.subr.bf16.mxu0 %v3391_v48 }
 0x2a2   :  { %v2439_v49 = vpop.f32.mrb[2].mxu1 }
 0x2a3   :  { %v2440_v52 = vpop.f32.mrb[3].mxu1 }
 0x2a4   :  { %v2441_v53 = vadd.f32 %v2440_v52, %v2439_v49  ;;  %v2839_v54 = vpop.f32.mrb[6].mxu0  ;;  %v1139_v49 = vld [vmem:[#allocation3 + $0x4b8] sm:$0xff]  ;;  %v1156_v52 = vld [vmem:[#allocation3 + $0x540] sm:$0xff] }
 0x2a5   :  { %v662_v55 = vpop.f32.mrb[7].mxu0 }
 0x2a6   :  { %v588_v25 = vadd.f32 %v2441_v53, %v2341_v24  ;;  %v2442_v56 = vpop.f32.mrb[4].mxu1  ;;  %v3403_v53 = vpack.c.bf16 %v1171_v45, %v1170_v44  ;;  %v3419_v44 = vpack.c.bf16 %v1179_v39, %v1178_v38  ;;  %v1381_v38 = vld [vmem:[#allocation3 + $0x6c0] sm:$0xff]  ;;  %v1382_v39 = vld [vmem:[#allocation3 + $0x6c8] sm:$0xff] }
 0x2a7   :  { %v2443_v3 = vpop.f32.mrb[5].mxu1 }
 0x2a8   :  { %v663_v57 = vadd.f32 %v662_v55, %v588_v25  ;;  %v2444_v59 = vadd.f32 %v2443_v3, %v2442_v56  ;;  %v1173_v55 = vld [vmem:[#allocation3 + $0x5c8] sm:$0xff]  ;;  %v1140_v56 = vld [vmem:[#allocation3 + $0x4c0] sm:$0xff] }
 0x2a9   :  { %v1141_v3 = vld [vmem:[#allocation3 + $0x4c8] sm:$0xff] }
 0x2aa   :  { %v3875_v36 = vmax.f32 %v663_v57, 0.0  ;;  %v593_v62 = vadd.f32 %v2444_v59, %v2341_v24  ;;  %v1157_v24 = vld [vmem:[#allocation3 + $0x548] sm:$0xff]  ;;  %v1158_v59 = vld [vmem:[#allocation3 + $0x550] sm:$0xff]  ;;  %v3377_v5 = vpack.c.bf16 %v1141_v3, %v1140_v56 }
 0x2ab   :  { %v3375_v25 = vpack.c.bf16 %v1157_v24, %v1156_v52 }
 0x2ac   :  { %v668_v63 = vadd.f32 %v2839_v54, %v593_v62  ;;  %v894_v0 = vsub.f32 %v80_v60, %v3875_v36  ;;  %v1172_v54 = vld [vmem:[#allocation3 + $0x5c0] sm:$0xff]  ;;  %v1159_v60 = vld [vmem:[#allocation3 + $0x558] sm:$0xff] }
 0x2ae   :  { %v3881_v2 = vmax.f32 %v668_v63, 0.0  ;;  %1029 = vmatprep.mubr.f32.mxu1 %v894_v0  ;;  %v896_v8 = vrot.slane %v894_v0, 7  ;;  %v902_v9 = vrot.slane %v894_v0, 1  ;;  %v2343_v63 = vld [vmem:[%s4210_s8 + $0x1] ss:$0 sm:$0xff]  ;;  %v3407_v0 = vpack.c.bf16 %v1173_v55, %v1172_v54 }
 0x2b0   :  { %v895_v4 = vsub.f32 %v81_v1, %v3881_v2 }
 0x2b2   :  { %v897_v7 = vrot.slane %v895_v4, 7  ;;  %v903_v10 = vrot.slane %v895_v4, 1 }
 0x2b4   :  { %v899_v13 = vsel %vm434_vm5, %v897_v7, %v896_v8  ;;  %v904_v14 = vsel %vm451_vm6, %v902_v9, %v903_v10  ;;  %v905_v16 = vsel %vm451_vm6, %v903_v10, %v902_v9  ;;  %v898_v28 = vsel %vm434_vm5, %v896_v8, %v897_v7  ;;  %v1175_v7 = vld [vmem:[#allocation3 + $0x5d8] sm:$0xff]  ;;  %v1142_v10 = vld [vmem:[#allocation3 + $0x4d0] sm:$0xff] }
 0x2b5   :  { %v900_v19 = vmul.f32 %v899_v13, %v3825_v58  ;;  %v906_v20 = vmul.f32 %v904_v14, %v3819_v50  ;;  %v907_v21 = vmul.f32 %v905_v16, %v3827_v61  ;;  %v901_v35 = vmul.f32 %v898_v28, %v3844_v23  ;;  %v1160_v14 = vld [vmem:[#allocation3 + $0x560] sm:$0xff]  ;;  %v1145_v28 = vld [vmem:[#allocation3 + $0x4e8] sm:$0xff] }
 0x2b6   :  { %v3379_v9 = vpack.c.bf16 %v1159_v60, %v1158_v59  ;;  %v3411_v17 = vpack.c.bf16 %v1175_v7, %v1174_v6  ;;  %v1373_v59 = vld [vmem:[#allocation3 + $0x680] sm:$0xff]  ;;  %v1374_v60 = vld [vmem:[#allocation3 + $0x688] sm:$0xff]  ;;  %v1375_v7 = vld [vmem:[#allocation3 + $0x690] sm:$0xff] }
 0x2b7   :  { %1030 = vmatmul.mubr.f32.vlgmr.msra.gmra.mrb[10].mxu1 %v900_v19  ;;  %2907 = vmatprep.mubr.f32.mxu0 %v906_v20  ;;  %v3381_v20 = vpack.c.bf16 %v1143_v11, %v1142_v10  ;;  %v1360_v11 = vld [vmem:[#allocation3 + $0x618] sm:$0xff] }
 0x2b8   :  { %3362 = vmatpush3.bf16.msra.mxu1 %v3361_v15  ;;  %1034 = vmatprep.mubr.f32.mxu1 %v895_v4  ;;  %v1161_v15 = vld [vmem:[#allocation3 + $0x568] sm:$0xff] }
 0x2b9   :  { %2908 = vmatmul.mubr.f32.vlgmr.msra.gmra.mrb[10].mxu0 %v907_v21  ;;  %3364 = vmatprep.subr.bf16.mxu1 %v3363_v22  ;;  %v1176_v21 = vld [vmem:[#allocation3 + $0x5e0] sm:$0xff]  ;;  %v1177_v22 = vld [vmem:[#allocation3 + $0x5e8] sm:$0xff]  ;;  %v3383_v26 = vpack.c.bf16 %v1161_v15, %v1160_v14 }
 0x2ba   :  { %3394 = vmatpush3.bf16.msra.mxu0 %v3391_v48  ;;  %v3373_v48 = vpack.c.bf16 %v1139_v49, %v1138_v47  ;;  %v3415_v33 = vpack.c.bf16 %v1177_v22, %v1176_v21  ;;  %v1393_v21 = vld [vmem:[#allocation3 + $0x720] sm:$0xff] }
 0x2bb   :  { %1035 = vmatmul.mubr.f32.gmra.mrb[12].mxu1 %v901_v35  ;;  %3396 = vmatprep.subr.bf16.mxu0 %v3395_v31 }
 0x2bc   :  { %3366 = vmatpush3.bf16.msra.mxu1 %v3365_v32  ;;  %v1163_v32 = vld [vmem:[#allocation3 + $0x578] sm:$0xff] }
 0x2bd   :  { %3368 = vmatprep.subr.bf16.mxu1 %v3367_v37  ;;  %v3385_v37 = vpack.c.bf16 %v1145_v28, %v1144_v27  ;;  %v1379_v28 = vld [vmem:[#allocation3 + $0x6b0] sm:$0xff] }
 0x2be   :  { %3398 = vmatpush3.bf16.msra.mxu0 %v3395_v31  ;;  %v1162_v31 = vld [vmem:[#allocation3 + $0x570] sm:$0xff] }
 0x2bf   :  { %3400 = vmatprep.subr.bf16.mxu0 %v3399_v42  ;;  %v3387_v40 = vpack.c.bf16 %v1163_v32, %v1162_v31  ;;  %v1363_v31 = vld [vmem:[#allocation3 + $0x630] sm:$0xff]  ;;  %v1364_v32 = vld [vmem:[#allocation3 + $0x638] sm:$0xff] }
 0x2c0   :  { %3370 = vmatpush3.bf16.msra.mxu1 %v3369_v43 }
 0x2c1   :  { %3372 = vmatprep.subr.bf16.mxu1 %v3371_v46 }
 0x2c2   :  { %3402 = vmatpush3.bf16.msra.mxu0 %v3399_v42  ;;  %v2495_v57 = vpop.f32.mrb[6].mxu1  ;;  %v1147_v42 = vld [vmem:[#allocation3 + $0x4f8] sm:$0xff] }
 0x2c3   :  { %v2496_v62 = vpop.f32.mrb[7].mxu1  ;;  %3404 = vmatprep.subr.bf16.mxu0 %v3403_v53  ;;  %v3389_v46 = vpack.c.bf16 %v1147_v42, %v1146_v41  ;;  %v1365_v41 = vld [vmem:[#allocation3 + $0x640] sm:$0xff]  ;;  %v1366_v42 = vld [vmem:[#allocation3 + $0x648] sm:$0xff] }
 0x2c4   :  { %v2497_v1 = vadd.f32 %v2496_v62, %v2495_v57  ;;  %v2874_v4 = vpop.f32.mrb[8].mxu0  ;;  %3374 = vmatpush3.bf16.msra.mxu1 %v3373_v48  ;;  %v1357_v62 = vld [vmem:[#allocation3 + $0x600] sm:$0xff] }
 0x2c5   :  { %v883_v8 = vpop.f32.mrb[9].mxu0  ;;  %3376 = vmatprep.subr.bf16.mxu1 %v3375_v25 }
 0x2c6   :  { %v809_v12 = vadd.f32 %v2497_v1, %v2343_v63  ;;  %3406 = vmatpush3.bf16.msra.mxu0 %v3403_v53  ;;  %v2498_v13 = vpop.f32.mrb[8].mxu1  ;;  %v1389_v1 = vld [vmem:[#allocation3 + $0x700] sm:$0xff] }
 0x2c7   :  { %v2499_v16 = vpop.f32.mrb[9].mxu1  ;;  %3408 = vmatprep.subr.bf16.mxu0 %v3407_v0 }
 0x2c8   :  { %v884_v18 = vadd.f32 %v883_v8, %v809_v12  ;;  %v2500_v19 = vadd.f32 %v2499_v16, %v2498_v13  ;;  %3378 = vmatpush3.bf16.msra.mxu1 %v3377_v5  ;;  %v1376_v8 = vld [vmem:[#allocation3 + $0x698] sm:$0xff]  ;;  %v1391_v12 = vld [vmem:[#allocation3 + $0x710] sm:$0xff]  ;;  %v1377_v16 = vld [vmem:[#allocation3 + $0x6a0] sm:$0xff] }
 0x2c9   :  { %3380 = vmatprep.subr.bf16.mxu1 %v3379_v9  ;;  %v1359_v9 = vld [vmem:[#allocation3 + $0x610] sm:$0xff]  ;;  %v3427_v10 = vpack.c.bf16 %v1376_v8, %v1375_v7  ;;  %v1392_v13 = vld [vmem:[#allocation3 + $0x718] sm:$0xff] }
 0x2ca   :  { %v892_v29 = vmax.f32 %v884_v18, 0.0  ;;  %v814_v30 = vadd.f32 %v2500_v19, %v2343_v63  ;;  %3410 = vmatpush3.bf16.msra.mxu0 %v3407_v0  ;;  %v3423_v63 = vpack.c.bf16 %v1374_v60, %v1373_v59  ;;  %v1358_v0 = vld [vmem:[#allocation3 + $0x608] sm:$0xff]  ;;  %v3429_v14 = vpack.c.bf16 %v1360_v11, %v1359_v9  ;;  %v1361_v19 = vld [vmem:[#allocation3 + $0x620] sm:$0xff]  ;;  %v1371_v7 = vld [vmem:[#allocation3 + $0x670] sm:$0xff] }
 0x2cb   :  { %3412 = vmatprep.subr.bf16.mxu0 %v3411_v17  ;;  %v3425_v5 = vpack.c.bf16 %v1358_v0, %v1357_v62  ;;  %v3459_v15 = vpack.c.bf16 %v1392_v13, %v1391_v12  ;;  %v1369_v59 = vld [vmem:[#allocation3 + $0x660] sm:$0xff]  ;;  %v1370_v60 = vld [vmem:[#allocation3 + $0x668] sm:$0xff]  ;;  %v1372_v8 = vld [vmem:[#allocation3 + $0x678] sm:$0xff] }
 0x2cc   :  { %v1117_v34 = vsub.f32 %v892_v29, %v3875_v36  ;;  %v889_v35 = vadd.f32 %v2874_v4, %v814_v30  ;;  %3382 = vmatpush3.bf16.msra.mxu1 %v3381_v20  ;;  %v1390_v4 = vld [vmem:[#allocation3 + $0x708] sm:$0xff]  ;;  %v1380_v29 = vld [vmem:[#allocation3 + $0x6b8] sm:$0xff]  ;;  %v1401_v62 = vld [vmem:[#allocation3 + $0x760] sm:$0xff] }
 0x2cd   :  { %3384 = vmatprep.subr.bf16.mxu1 %v3383_v26  ;;  %v3455_v6 = vpack.c.bf16 %v1390_v4, %v1389_v1  ;;  %v1362_v20 = vld [vmem:[#allocation3 + $0x628] sm:$0xff]  ;;  %v3435_v30 = vpack.c.bf16 %v1380_v29, %v1379_v28  ;;  %v1387_v4 = vld [vmem:[#allocation3 + $0x6f0] sm:$0xff]  ;;  %v1404_v11 = vld [vmem:[#allocation3 + $0x778] sm:$0xff] }
 0x2ce   :  { %v893_v43 = vmax.f32 %v889_v35, 0.0  ;;  %3414 = vmatpush3.bf16.msra.mxu0 %v3411_v17  ;;  %1252 = vmatprep.mubr.f32.mxu1 %v1117_v34  ;;  %v1119_v47 = vrot.slane %v1117_v34, 7  ;;  %v1125_v49 = vrot.slane %v1117_v34, 1  ;;  %v1378_v17 = vld [vmem:[#allocation3 + $0x6a8] sm:$0xff]  ;;  %v3433_v22 = vpack.c.bf16 %v1362_v20, %v1361_v19  ;;  %v1395_v34 = vld [vmem:[#allocation3 + $0x730] sm:$0xff]  ;;  %v1396_v35 = vld [vmem:[#allocation3 + $0x738] sm:$0xff] }
 0x2cf   :  { %3416 = vmatprep.subr.bf16.mxu0 %v3415_v33  ;;  %v3431_v18 = vpack.c.bf16 %v1378_v17, %v1377_v16  ;;  %v1394_v26 = vld [vmem:[#allocation3 + $0x728] sm:$0xff]  ;;  %v1403_v9 = vld [vmem:[#allocation3 + $0x770] sm:$0xff]  ;;  %v1565_v13 = vld [vmem:[%s4211_s9] sm:$0xff] }
 0x2d0   :  { %v1118_v45 = vsub.f32 %v893_v43, %v3881_v2  ;;  %3386 = vmatpush3.bf16.msra.mxu1 %v3385_v37  ;;  %v3463_v27 = vpack.c.bf16 %v1394_v26, %v1393_v21  ;;  %v3467_v37 = vpack.c.bf16 %v1396_v35, %v1395_v34  ;;  %v1397_v43 = vld [vmem:[#allocation3 + $0x740] sm:$0xff]  ;;  %v1402_v0 = vld [vmem:[#allocation3 + $0x768] sm:$0xff]  ;;  %v3483_v12 = vpack.c.bf16 %v1404_v11, %v1403_v9 }
 0x2d1   :  { %3388 = vmatprep.subr.bf16.mxu1 %v3387_v40  ;;  %v3439_v40 = vpack.c.bf16 %v1382_v39, %v1381_v38  ;;  %v3479_v1 = vpack.c.bf16 %v1402_v0, %v1401_v62  ;;  %v2347_v34 = vld [vmem:[%s4210_s8 + $0x3] ss:$0 sm:$0xff]  ;;  %v1575_v11 = vld [vmem:[%s4211_s9 + $0x50] sm:$0xff] }
 0x2d2   :  { %v1120_v52 = vrot.slane %v1118_v45, 7  ;;  %3418 = vmatpush3.bf16.msra.mxu0 %v3415_v33  ;;  %v1126_v24 = vrot.slane %v1118_v45, 1  ;;  %v3437_v33 = vpack.c.bf16 %v1364_v32, %v1363_v31  ;;  %v1573_v9 = vld [vmem:[%s4211_s9 + $0x40] sm:$0xff] }
 0x2d3   :  { %3420 = vmatprep.subr.bf16.mxu0 %v3419_v44 }
 0x2d4   :  { %3390 = vmatpush3.bf16.msra.mxu1 %v3389_v46  ;;  %v1122_v53 = vsel %vm434_vm5, %v1120_v52, %v1119_v47  ;;  %v1127_v48 = vsel %vm451_vm6, %v1125_v49, %v1126_v24  ;;  %v1128_v54 = vsel %vm451_vm6, %v1126_v24, %v1125_v49  ;;  %v1121_v55 = vsel %vm434_vm5, %v1119_v47, %v1120_v52  ;;  %v1383_v47 = vld [vmem:[#allocation3 + $0x6d0] sm:$0xff]  ;;  %v1384_v49 = vld [vmem:[#allocation3 + $0x6d8] sm:$0xff] }
 0x2d5   :  { %v1123_v25 = vmul.f32 %v1122_v53, %v3825_v58  ;;  %v1129_v56 = vmul.f32 %v1127_v48, %v3819_v50  ;;  %v1130_v3 = vmul.f32 %v1128_v54, %v3827_v61  ;;  %v1124_v57 = vmul.f32 %v1121_v55, %v3844_v23  ;;  %3424 = vmatprep.subr.bf16.mxu1 %v3423_v63  ;;  %v1367_v24 = vld [vmem:[#allocation3 + $0x650] sm:$0xff]  ;;  %v1368_v53 = vld [vmem:[#allocation3 + $0x658] sm:$0xff] }
 0x2d6   :  { %3422 = vmatpush3.bf16.msra.mxu0 %v3419_v44  ;;  %v3441_v44 = vpack.c.bf16 %v1366_v42, %v1365_v41  ;;  %v3443_v52 = vpack.c.bf16 %v1384_v49, %v1383_v47  ;;  %v1399_v48 = vld [vmem:[#allocation3 + $0x750] sm:$0xff]  ;;  %v3445_v54 = vpack.c.bf16 %v1368_v53, %v1367_v24  ;;  %v1400_v55 = vld [vmem:[#allocation3 + $0x758] sm:$0xff]  ;;  %v3449_v63 = vpack.c.bf16 %v1370_v60, %v1369_v59 }
 0x2d7   :  { %1253 = vmatmul.mubr.f32.vlgmr.msra.gmra.mrb[14].mxu1 %v1123_v25  ;;  %2942 = vmatprep.mubr.f32.mxu0 %v1129_v56  ;;  %v3475_v25 = vpack.c.bf16 %v1400_v55, %v1399_v48  ;;  %v1385_v56 = vld [vmem:[#allocation3 + $0x6e0] sm:$0xff]  ;;  %v1568_v59 = vld [vmem:[%s4211_s9 + $0x18] sm:$0xff] }
 0x2d8   :  { %1257 = vmatprep.mubr.f32.mxu1 %v1118_v45  ;;  %3426 = vmatpush3.bf16.msra.mxu1 %v3425_v5  ;;  %v1398_v45 = vld [vmem:[#allocation3 + $0x748] sm:$0xff]  ;;  %v1388_v5 = vld [vmem:[#allocation3 + $0x6f8] sm:$0xff] }
 0x2d9   :  { %2943 = vmatmul.mubr.f32.vlgmr.msra.gmra.mrb[12].mxu0 %v1130_v3  ;;  %3456 = vmatprep.subr.bf16.mxu0 %v3455_v6  ;;  %v3471_v46 = vpack.c.bf16 %v1398_v45, %v1397_v43  ;;  %v1386_v3 = vld [vmem:[#allocation3 + $0x6e8] sm:$0xff] }
 0x2da   :  { %3458 = vmatpush3.bf16.msra.mxu0 %v3455_v6  ;;  %3428 = vmatprep.subr.bf16.mxu1 %v3427_v10  ;;  %v3451_v6 = vpack.c.bf16 %v1388_v5, %v1387_v4  ;;  %v3453_v10 = vpack.c.bf16 %v1372_v8, %v1371_v7  ;;  %v1569_v5 = vld [vmem:[%s4211_s9 + $0x20] sm:$0xff] }
 0x2db   :  { %1258 = vmatmul.mubr.f32.gmra.mrb[16].mxu1 %v1124_v57  ;;  %3460 = vmatprep.subr.bf16.mxu0 %v3459_v15  ;;  %v3447_v57 = vpack.c.bf16 %v1386_v3, %v1385_v56 }
 0x2dc   :  { %3430 = vmatpush3.bf16.msra.mxu1 %v3429_v14  ;;  %v1566_v14 = vld [vmem:[%s4211_s9 + $0x8] sm:$0xff] }
 0x2dd   :  { %3432 = vmatprep.subr.bf16.mxu1 %v3431_v18  ;;  %v2345_v18 = vld [vmem:[%s4210_s8 + $0x2] ss:$0 sm:$0xff] }
 0x2de   :  { %3462 = vmatpush3.bf16.msra.mxu0 %v3459_v15  ;;  %v3487_v15 = vpack.c.bf16 %v1566_v14, %v1565_v13  ;;  %v1577_v14 = vld [vmem:[%s4211_s9 + $0x60] sm:$0xff] }
 0x2df   :  { %3464 = vmatprep.subr.bf16.mxu0 %v3463_v27 }
 0x2e0   :  { %3434 = vmatpush3.bf16.msra.mxu1 %v3433_v22 }
 0x2e1   :  { %3436 = vmatprep.subr.bf16.mxu1 %v3435_v30 }
 0x2e2   :  { %3466 = vmatpush3.bf16.msra.mxu0 %v3463_v27 }
 0x2e3   :  { %3468 = vmatprep.subr.bf16.mxu0 %v3467_v37 }
 0x2e4   :  { %3438 = vmatpush3.bf16.msra.mxu1 %v3437_v33 }
 0x2e5   :  { %3440 = vmatprep.subr.bf16.mxu1 %v3439_v40 }
 0x2e6   :  { %3470 = vmatpush3.bf16.msra.mxu0 %v3467_v37 }
 0x2e7   :  { %3472 = vmatprep.subr.bf16.mxu0 %v3471_v46 }
 0x2e8   :  { %3442 = vmatpush3.bf16.msra.mxu1 %v3441_v44 }
 0x2e9   :  { %3444 = vmatprep.subr.bf16.mxu1 %v3443_v52 }
 0x2ea   :  { %3474 = vmatpush3.bf16.msra.mxu0 %v3471_v46 }
 0x2eb   :  { %3476 = vmatprep.subr.bf16.mxu0 %v3475_v25 }
 0x2ec   :  { %3446 = vmatpush3.bf16.msra.mxu1 %v3445_v54 }
 0x2ed   :  { %3448 = vmatprep.subr.bf16.mxu1 %v3447_v57  ;;  %v1567_v57 = vld [vmem:[%s4211_s9 + $0x10] sm:$0xff] }
 0x2ee   :  { %3478 = vmatpush3.bf16.msra.mxu0 %v3475_v25  ;;  %v3491_v4 = vpack.c.bf16 %v1568_v59, %v1567_v57 }
 0x2ef   :  { %3480 = vmatprep.subr.bf16.mxu0 %v3479_v1 }
 0x2f0   :  { %3450 = vmatpush3.bf16.msra.mxu1 %v3449_v63 }
 0x2f1   :  { %3452 = vmatprep.subr.bf16.mxu1 %v3451_v6  ;;  %v1570_v6 = vld [vmem:[%s4211_s9 + $0x28] sm:$0xff] }
 0x2f2   :  { %3482 = vmatpush3.bf16.msra.mxu0 %v3479_v1 }
 0x2f3   :  { %3484 = vmatprep.subr.bf16.mxu0 %v3483_v12 }
 0x2f4   :  { %3454 = vmatpush3.bf16.msra.mxu1 %v3453_v10 }
 0x2f5   :  { %3488 = vmatprep.subr.bf16.mxu1 %v3487_v15 }
 0x2f6   :  { %3486 = vmatpush3.bf16.msra.mxu0 %v3483_v12  ;;  %v1576_v12 = vld [vmem:[%s4211_s9 + $0x58] sm:$0xff] }
 0x2f7   :  { %v3507_v13 = vpack.c.bf16 %v1576_v12, %v1575_v11  ;;  %v1762_v11 = vld [vmem:[%s4216_s14 + $0x8] sm:$0xff]  ;;  %v1686_v12 = vld [vmem:[%s4214_s12] sm:$0xf] }
 0x38a   :  { %v2551_v16 = vpop.f32.mrb[10].mxu1 }
 0x38b   :  { %v2552_v17 = vpop.f32.mrb[11].mxu1 }
 0x38c   :  { %v2553_v19 = vadd.f32 %v2552_v17, %v2551_v16  ;;  %v2909_v20 = vpop.f32.mrb[10].mxu0  ;;  %v1579_v17 = vld [vmem:[%s4211_s9 + $0x70] sm:$0xff] }
 0x38d   :  { %v1106_v21 = vpop.f32.mrb[11].mxu0 }
 0x38e   :  { %v1032_v22 = vadd.f32 %v2553_v19, %v2345_v18  ;;  %v2554_v26 = vpop.f32.mrb[12].mxu1 }
 0x38f   :  { %v2555_v27 = vpop.f32.mrb[13].mxu1 }
 0x390   :  { %v1107_v28 = vadd.f32 %v1106_v21, %v1032_v22  ;;  %v2556_v29 = vadd.f32 %v2555_v27, %v2554_v26  ;;  %v2349_v26 = vld [vmem:[%s4210_s8 + $0x4] ss:$0 sm:$0xff] }
 0x392   :  { %v1037_v30 = vadd.f32 %v2556_v29, %v2345_v18  ;;  %v1115_v44 = vmax.f32 %v1107_v28, 0.0  ;;  %v1580_v18 = vld [vmem:[%s4211_s9 + $0x78] sm:$0xff] }
 0x393   :  { %v3515_v19 = vpack.c.bf16 %v1580_v18, %v1579_v17  ;;  %v2353_v17 = vld [vmem:[%s4216_s14 + $0x20] sm:$0xff]  ;;  %v2354_v18 = vld [vmem:[%s4216_s14 + $0x28] sm:$0xff] }
 0x394   :  { %v1112_v31 = vadd.f32 %v2909_v20, %v1037_v30 }
 0x396   :  { %v1116_v52 = vmax.f32 %v1112_v31, 0.0 }
 0x3aa   :  { %v2607_v32 = vpop.f32.mrb[14].mxu1 }
 0x3ab   :  { %v2608_v33 = vpop.f32.mrb[15].mxu1 }
 0x3ac   :  { %v2609_v35 = vadd.f32 %v2608_v33, %v2607_v32  ;;  %v2944_v37 = vpop.f32.mrb[12].mxu0 }
 0x3ad   :  { %v1329_v38 = vpop.f32.mrb[13].mxu0 }
 0x3ae   :  { %v1255_v39 = vadd.f32 %v2609_v35, %v2347_v34  ;;  %v2610_v40 = vpop.f32.mrb[16].mxu1 }
 0x3af   :  { %v2611_v41 = vpop.f32.mrb[17].mxu1 }
 0x3b0   :  { %v1330_v42 = vadd.f32 %v1329_v38, %v1255_v39  ;;  %v2612_v43 = vadd.f32 %v2611_v41, %v2610_v40 }
 0x3b2   :  { %v1338_v45 = vmax.f32 %v1330_v42, 0.0  ;;  %v1260_v46 = vadd.f32 %v2612_v43, %v2347_v34 }
 0x3b4   :  { %v1340_v47 = vadd.f32 %v1338_v45, %v1115_v44  ;;  %v1335_v49 = vadd.f32 %v2944_v37, %v1260_v46  ;;  %v3634_v46 = vmov 0.0|0.0  }
 0x3b5   :  { %3519 = vmatprep.subr.bf16.mxu0 %v3634_v46 }
 0x3b6   :  { %v1339_v24 = vmax.f32 %v1335_v49, 0.0  ;;  %v1342_v53 = vadd.f32 %v1340_v47, %v3875_v36  ;;  %v3636_v47 = vmov 0.0   ;;  %v2358_v49 = vld [vmem:[%s4216_s14 + $0x40] sm:$0xff] }
 0x3b8   :  { %v1341_v48 = vadd.f32 %v1339_v24, %v1116_v52  ;;  %1477 = vmatprep.mubr.f32.mxu1 %v1342_v53  ;;  %v1344_v25 = vrot.slane %v1342_v53, 7  ;;  %v1350_v56 = vrot.slane %v1342_v53, 1  ;;  %v2359_v52 = vld [vmem:[%s4216_s14 + $0x48] sm:$0xff]  ;;  %v2360_v53 = vld [vmem:[%s4216_s14 + $0x50] sm:$0xff] }
 0x3b9   :  { %v3535_v24 = vpack.c.bf16 %v2359_v52, %v2358_v49  ;;  %v2375_v52 = vld [vmem:[%s4215_s13 + $0xb0] sm:$0xff] }
 0x3ba   :  { %v1343_v54 = vadd.f32 %v1341_v48, %v3881_v2  ;;  %v2361_v48 = vld [vmem:[%s4216_s14 + $0x58] sm:$0xff] }
 0x3bc   :  { %v1345_v55 = vrot.slane %v1343_v54, 7  ;;  %v1351_v3 = vrot.slane %v1343_v54, 1 }
 0x3be   :  { %v1347_v60 = vsel %vm434_vm5, %v1345_v55, %v1344_v25  ;;  %v1352_v36 = vsel %vm451_vm6, %v1350_v56, %v1351_v3  ;;  %v1353_v2 = vsel %vm451_vm6, %v1351_v3, %v1350_v56  ;;  %v1346_v62 = vsel %vm434_vm5, %v1344_v25, %v1345_v55  ;;  %v1589_v55 = vpop.permute.xlu0 %1588 }
 0x3bf   :  { %v1348_v63 = vmul.f32 %v1347_v60, %v3825_v58  ;;  %v1354_v0 = vmul.f32 %v1352_v36, %v3819_v50  ;;  %v1355_v1 = vmul.f32 %v1353_v2, %v3827_v61  ;;  %v1349_v7 = vmul.f32 %v1346_v62, %v3844_v23  ;;  %v1571_v58 = vld [vmem:[%s4211_s9 + $0x30] sm:$0xff]  ;;  %v1572_v61 = vld [vmem:[%s4211_s9 + $0x38] sm:$0xff]  ;;  %v1574_v23 = vld [vmem:[%s4211_s9 + $0x48] sm:$0xff] }
 0x3c0   :  { %v3495_v50 = vpack.c.bf16 %v1570_v6, %v1569_v5  ;;  %v3499_v8 = vpack.c.bf16 %v1572_v61, %v1571_v58  ;;  %v3503_v10 = vpack.c.bf16 %v1574_v23, %v1573_v9 }
 0x3c1   :  { %1478 = vmatmul.mubr.f32.vlgmr.msra.gmra.mrb[18].mxu1 %v1348_v63  ;;  %2977 = vmatprep.mubr.f32.mxu0 %v1354_v0 }
 0x3c2   :  { %1482 = vmatprep.mubr.f32.mxu1 %v1343_v54  ;;  %2978 = vmatmul.mubr.f32.vlgmr.msra.gmra.mrb[14].mxu0 %v1355_v1  ;;  %v3538_v54 = vpack.c.bf16 %v2361_v48, %v2360_v53  ;;  %v2150_v48 = vld [vmem:[%s4215_s13 + $0x10] sm:$0xff] }
 0x3c3   :  { %3490 = vmatpush3.bf16.msra.mxu1 %v3487_v15  ;;  %v1578_v15 = vld [vmem:[%s4211_s9 + $0x68] sm:$0xff]  ;;  %3019 = vmatprep.mubr.msk.f32.mxu0 %vm3635_vm7, %v3636_v47 }
 0x3c4   :  { %3492 = vmatprep.subr.bf16.mxu1 %v3491_v4  ;;  %v3511_v16 = vpack.c.bf16 %v1578_v15, %v1577_v14  ;;  %v1763_v14 = vld [vmem:[%s4216_s14 + $0x10] sm:$0xff]  ;;  %v1764_v15 = vld [vmem:[%s4216_s14 + $0x18] sm:$0xff] }
 0x3c5   :  { %1483 = vmatmul.mubr.f32.gmra.mrb[20].mxu1 %v1349_v7 }
 0x3c7   :  { %3494 = vmatpush3.bf16.msra.mxu1 %v3491_v4 }
 0x3c8   :  { %3496 = vmatprep.subr.bf16.mxu1 %v3495_v50 }
 0x3cb   :  { %3498 = vmatpush3.bf16.msra.mxu1 %v3495_v50 }
 0x3cc   :  { %3500 = vmatprep.subr.bf16.mxu1 %v3499_v8 }
 0x3cf   :  { %3502 = vmatpush3.bf16.msra.mxu1 %v3499_v8 }
 0x3d0   :  { %3504 = vmatprep.subr.bf16.mxu1 %v3503_v10 }
 0x3d3   :  { %3506 = vmatpush3.bf16.msra.mxu1 %v3503_v10  ;;  %v1761_v10 = vld [vmem:[%s4216_s14] sm:$0xff] }
 0x3d4   :  { %3508 = vmatprep.subr.bf16.mxu1 %v3507_v13 }
 0x3d7   :  { %3510 = vmatpush3.bf16.msra.mxu1 %v3507_v13  ;;  %v3523_v13 = vpack.c.bf16 %v1762_v11, %v1761_v10  ;;  %v2161_v10 = vld [vmem:[%s4215_s13 + $0x68] sm:$0xff] }
 0x3d8   :  { %3512 = vmatprep.subr.bf16.mxu1 %v3511_v16 }
 0x3db   :  { %3514 = vmatpush3.bf16.msra.mxu1 %v3511_v16  ;;  %v3526_v16 = vpack.c.bf16 %v1764_v15, %v1763_v14  ;;  %v2384_v15 = vld [vmem:[%s4215_s13 + $0xf8] sm:$0xff] }
 0x3dc   :  { %3516 = vmatprep.subr.bf16.mxu1 %v3515_v19 }
 0x3df   :  { %3518 = vmatpush3.bf16.msra.mxu1 %v3515_v19  ;;  %v3529_v19 = vpack.c.bf16 %v2354_v18, %v2353_v17 }
 0x3e0   :  { %3534 = vmatprep.subr.bf16.mxu1 %v3634_v46 }
 0x494   :  { %v2663_v20 = vpop.f32.mrb[18].mxu1 }
 0x495   :  { %v2664_v21 = vpop.f32.mrb[19].mxu1  ;;  %v2979_v22 = vpop.f32.mrb[14].mxu0 }
 0x496   :  { %v2665_v27 = vadd.f32 %v2664_v21, %v2663_v20  ;;  %v1554_v28 = vpop.f32.mrb[15].mxu0  ;;  %v2355_v20 = vld [vmem:[%s4216_s14 + $0x30] sm:$0xff]  ;;  %v2356_v21 = vld [vmem:[%s4216_s14 + $0x38] sm:$0xff] }
 0x498   :  { %v1480_v29 = vadd.f32 %v2665_v27, %v2349_v26  ;;  %v2666_v30 = vpop.f32.mrb[20].mxu1 }
 0x499   :  { %v2667_v31 = vpop.f32.mrb[21].mxu1 }
 0x49a   :  { %v1555_v32 = vadd.f32 %v1554_v28, %v1480_v29  ;;  %v2668_v33 = vadd.f32 %v2667_v31, %v2666_v30  ;;  %v3532_v29 = vpack.c.bf16 %v2356_v21, %v2355_v20  ;;  %v2074_v30 = vld [vmem:[%s4213_s11] sm:$0xff] }
 0x49c   :  { %v1563_v34 = vmax.f32 %v1555_v32, 0.0  ;;  %v1485_v35 = vadd.f32 %v2668_v33, %v2349_v26  ;;  %v2370_v26 = vld [vmem:[%s4215_s13 + $0x88] sm:$0xff]  ;;  %v2363_v32 = vld [vmem:[%s4216_s14 + $0x60] sm:$0xff] }
 0x49d   :  { %v2364_v33 = vld [vmem:[%s4216_s14 + $0x68] sm:$0xff] }
 0x49e   :  { %v1560_v37 = vadd.f32 %v2979_v22, %v1485_v35  ;;  %3012 = vmatprep.mubr.f32.mxu1 %v1563_v34  ;;  %v2068_v39 = vrot.slane %v1563_v34, 1  ;;  %v2369_v22 = vld [vmem:[%s4215_s13 + $0x80] sm:$0xff]  ;;  %v2372_v35 = vld [vmem:[%s4215_s13 + $0x98] sm:$0xff] }
 0x49f   :  { %v3574_v31 = vpack.c.bf16 %v2370_v26, %v2369_v22 }
 0x4a0   :  { %v1564_v38 = vmax.f32 %v1560_v37, 0.0  ;;  %v3541_v37 = vpack.c.bf16 %v2364_v33, %v2363_v32 }
 0x4a2   :  { %v2069_v40 = vrot.slane %v1564_v38, 1  ;;  %3013 = vmatmul.mubr.f32.vlgmr.msra.gmra.mrb[22].mxu1 %v1564_v38 }
 0x4a3   :  { %3052 = vmatprep.mubr.msk.f32.mxu1 %vm3635_vm7, %v3636_v47  ;;  %3536 = vmatpush3.bf16.msra.mxu1 %v3535_v24  ;;  %v2376_v24 = vld [vmem:[%s4215_s13 + $0xb8] sm:$0xff] }
 0x4a4   :  { %v2070_v41 = vsel %vm451_vm6, %v2068_v39, %v2069_v40  ;;  %v2071_v42 = vsel %vm451_vm6, %v2069_v40, %v2068_v39  ;;  %3537 = vmatprep.subr.bf16.mxu1 %v3634_v46  ;;  %v2366_v39 = vld [vmem:[%s4216_s14 + $0x78] sm:$0xff] }
 0x4a5   :  { %v2072_v43 = vmax.f32 %v1563_v34, %v2070_v41  ;;  %v2073_v44 = vmax.f32 %v1564_v38, %v2071_v42  ;;  %v2371_v34 = vld [vmem:[%s4215_s13 + $0x90] sm:$0xff]  ;;  %v2373_v41 = vld [vmem:[%s4215_s13 + $0xa0] sm:$0xff]  ;;  %v2374_v42 = vld [vmem:[%s4215_s13 + $0xa8] sm:$0xff] }
 0x4a6   :  { %v2365_v38 = vld [vmem:[%s4216_s14 + $0x70] sm:$0xff]  ;;  %v3577_v40 = vpack.c.bf16 %v2372_v35, %v2371_v34  ;;  %v3580_v49 = vpack.c.bf16 %v2374_v42, %v2373_v41 }
 0x4a7   :  { %v3988_v45 = vpack.c.bf16 %v2073_v44, %v2072_v43  ;;  %3539 = vmatpush3.bf16.msra.mxu1 %v3538_v54  ;;  %v3544_v43 = vpack.c.bf16 %v2366_v39, %v2365_v38  ;;  %v2148_v44 = vld [vmem:[%s4215_s13] sm:$0xff]  ;;  %v2151_v54 = vld [vmem:[%s4215_s13 + $0x18] sm:$0xff] }
 0x4a8   :  { %3546 = vmatprep.subr.bf16.mxu1 %v3634_v46 }
 0x575   :  { %v3014_v25 = vpop.f32.mrb[22].mxu1 }
 0x576   :  { %v1663_v56 = vadd.f32 %v3014_v25, %v1589_v55  ;;  %v1657_v3 = vpop.f32.mrb[23].mxu1  ;;  %v2377_v25 = vld [vmem:[%s4215_s13 + $0xc0] sm:$0xff] }
 0x577   :  { %v1658_v57 = vadd.f32 %v1657_v3, %v1589_v55  ;;  %v3583_v55 = vpack.c.bf16 %v2376_v24, %v2375_v52  ;;  %v3553_v3 = vpack.c.bf16 %v2151_v54, %v2150_v48 }
 0x578   :  { %v1667_v59 = vrot.slane %v1663_v56, 1  ;;  %v1673_v60 = vrot.slane %v1663_v56, 2  ;;  %v1678_v36 = vrot.slane %v1663_v56, 3 }
 0x579   :  { %v1666_v2 = vrot.slane %v1658_v57, 1  ;;  %v1672_v62 = vrot.slane %v1658_v57, 2  ;;  %v1677_v63 = vrot.slane %v1658_v57, 3 }
 0x57b   :  { %v1668_v0 = vsel %vm451_vm6, %v1666_v2, %v1667_v59  ;;  %v1669_v1 = vsel %vm451_vm6, %v1667_v59, %v1666_v2  ;;  %v1675_v4 = vsel %vm1674_vm8, %v1672_v62, %v1673_v60  ;;  %v1676_v5 = vsel %vm1674_vm8, %v1673_v60, %v1672_v62  ;;  %v2153_v59 = vld [vmem:[%s4215_s13 + $0x28] sm:$0xff]  ;;  %v2154_v62 = vld [vmem:[%s4215_s13 + $0x30] sm:$0xff] }
 0x57c   :  { %v1670_v6 = vmax.f32 %v1658_v57, %v1668_v0  ;;  %v1671_v7 = vmax.f32 %v1663_v56, %v1669_v1  ;;  %v1680_v50 = vsel %vm1679_vm9, %v1677_v63, %v1678_v36  ;;  %v1681_v58 = vsel %vm1679_vm9, %v1678_v36, %v1677_v63  ;;  %v2378_v56 = vld [vmem:[%s4215_s13 + $0xc8] sm:$0xff]  ;;  %v2152_v57 = vld [vmem:[%s4215_s13 + $0x20] sm:$0xff]  ;;  %v2379_v36 = vld [vmem:[%s4215_s13 + $0xd0] sm:$0xff] }
 0x57d   :  { %v1682_v61 = vmax.f32 %v1675_v4, %v1680_v50  ;;  %v1683_v8 = vmax.f32 %v1676_v5, %v1681_v58  ;;  %v3586_v60 = vpack.c.bf16 %v2378_v56, %v2377_v25  ;;  %v3556_v2 = vpack.c.bf16 %v2153_v59, %v2152_v57  ;;  %v2155_v63 = vld [vmem:[%s4215_s13 + $0x38] sm:$0xff]  ;;  %v2381_v1 = vld [vmem:[%s4215_s13 + $0xe0] sm:$0xff]  ;;  %v2382_v4 = vld [vmem:[%s4215_s13 + $0xe8] sm:$0xff] }
 0x57e   :  { %v3559_v5 = vpack.c.bf16 %v2155_v63, %v2154_v62  ;;  %v3592_v50 = vpack.c.bf16 %v2382_v4, %v2381_v1 }
 0x57f   :  { %v1684_v9 = vmax.f32 %v1670_v6, %v1682_v61  ;;  %v1685_v23 = vmax.f32 %v1671_v7, %v1683_v8  ;;  %v2156_v6 = vld [vmem:[%s4215_s13 + $0x40] sm:$0xff]  ;;  %v2157_v7 = vld [vmem:[%s4215_s13 + $0x48] sm:$0xff]  ;;  %v2158_v61 = vld [vmem:[%s4215_s13 + $0x50] sm:$0xff] }
 0x580   :  { %v3562_v58 = vpack.c.bf16 %v2157_v7, %v2156_v6  ;;  %v2159_v8 = vld [vmem:[%s4215_s13 + $0x58] sm:$0xff] }
 0x581   :  { %v3520_v51 = vpack.c.bf16 %v1685_v23, %v1684_v9  ;;  %v3565_v9 = vpack.c.bf16 %v2159_v8, %v2158_v61  ;;  %v2160_v23 = vld [vmem:[%s4215_s13 + $0x60] sm:$0xff] }
 0x582   :  { %v3568_v11 = vpack.c.bf16 %v2161_v10, %v2160_v23 }
 0x583   :  { %3521 = vmatpush3.bf16.msra.mxu0 %v3520_v51  ;;  %v2162_v51 = vld [vmem:[%s4215_s13 + $0x70] sm:$0xff] }
 0x584   :  { %3522 = vmatprep.subr.bf16.mxu0 %v3634_v46 }
 0x586   :  { %3020 = vmatmul.mubr.msk.f32.vlgmr.msra.gmra.mrb[16].mxu0 %vm1687_vm10, %v1686_v12  ;;  %v2163_v12 = vld [vmem:[%s4215_s13 + $0x78] sm:$0xff] }
 0x587   :  { %3524 = vmatpush3.bf16.msra.mxu0 %v3523_v13  ;;  %3030 = vmatprep.mubr.msk.f32.mxu0 %vm3635_vm7, %v3636_v47  ;;  %v2383_v13 = vld [vmem:[%s4215_s13 + $0xf0] sm:$0xff]  ;;  %v3571_v14 = vpack.c.bf16 %v2163_v12, %v2162_v51 }
 0x588   :  { %3525 = vmatprep.subr.bf16.mxu0 %v3634_v46 }
 0x58b   :  { %3527 = vmatpush3.bf16.msra.mxu0 %v3526_v16  ;;  %v3595_v16 = vpack.c.bf16 %v2384_v15, %v2383_v13 }
 0x58c   :  { %3528 = vmatprep.subr.bf16.mxu0 %v3634_v46 }
 0x659   :  { %v1757_v27 = vpop.f32.mrb[16].mxu0 }
 0x65a   :  { %v3021_v28 = vpop.f32.mrb[17].mxu0  ;;  %3031 = vmatmul.mubr.msk.f32.vlgmr.msra.gmra.mrb[18].mxu0 %vm174_vm3, %v1757_v27  ;;  %3053 = vmatmul.mubr.msk.f32.vlgmr.msra.gmra.mrb[24].mxu1 %vm174_vm3, %v1757_v27 }
 0x65b   :  { %3530 = vmatpush3.bf16.msra.mxu0 %v3529_v19  ;;  %3548 = vmatpush3.bf16.msra.mxu1 %v3988_v45  ;;  %v2149_v45 = vld [vmem:[%s4215_s13 + $0x8] sm:$0xff] }
 0x65c   :  { %3531 = vmatprep.subr.bf16.mxu0 %v3634_v46  ;;  %3070 = vmatprep.mubr.msk.f32.mxu1 %vm3635_vm7, %v3636_v47  ;;  %v3550_v53 = vpack.c.bf16 %v2149_v45, %v2148_v44 }
 0x65d   :  { %3041 = vmatprep.mubr.msk.f32.mxu0 %vm3635_vm7, %v3636_v47  ;;  %3573 = vmatprep.subr.bf16.mxu1 %v3634_v46 }
 0x65e   :  { %3071 = vmatmul.mubr.msk.f32.vlgmr.msra.gmra.mrb[26].mxu1 %vm1687_vm10, %v2074_v30 }
 0x65f   :  { %3533 = vmatpush3.bf16.msra.mxu0 %v3532_v29  ;;  %3575 = vmatpush3.bf16.msra.mxu1 %v3574_v31 }
 0x660   :  { %3540 = vmatprep.subr.bf16.mxu0 %v3634_v46  ;;  %3576 = vmatprep.subr.bf16.mxu1 %v3634_v46 }
 0x661   :  { %3140 = vmatprep.mubr.msk.f32.mxu1 %vm3635_vm7, %v3636_v47 }
 0x662   :  { %3042 = vmatmul.mubr.msk.f32.vlgmr.msra.gmra.mrb[20].mxu0 %vm174_vm3, %v1757_v27 }
 0x663   :  { %3542 = vmatpush3.bf16.msra.mxu0 %v3541_v37  ;;  %3063 = vmatprep.mubr.msk.f32.mxu0 %vm3635_vm7, %v3636_v47 }
 0x664   :  { %3543 = vmatprep.subr.bf16.mxu0 %v3634_v46  ;;  %3578 = vmatpush3.bf16.msra.mxu1 %v3577_v40 }
 0x665   :  { %3579 = vmatprep.subr.bf16.mxu1 %v3634_v46 }
 0x667   :  { %3545 = vmatpush3.bf16.msra.mxu0 %v3544_v43 }
 0x668   :  { %3549 = vmatprep.subr.bf16.mxu0 %v3634_v46  ;;  %3581 = vmatpush3.bf16.msra.mxu1 %v3580_v49 }
 0x669   :  { %3582 = vmatprep.subr.bf16.mxu1 %v3634_v46 }
 0x66a   :  { %3064 = vmatmul.mubr.msk.f32.vlgmr.msra.gmra.mrb[22].mxu0 %vm174_vm3, %v1757_v27 }
 0x66b   :  { %3551 = vmatpush3.bf16.msra.mxu0 %v3550_v53  ;;  %3105 = vmatprep.mubr.msk.f32.mxu0 %vm3635_vm7, %v3636_v47  ;;  %v2380_v47 = vld [vmem:[%s4215_s13 + $0xd8] sm:$0xff] }
 0x66c   :  { %3552 = vmatprep.subr.bf16.mxu0 %v3634_v46  ;;  %3584 = vmatpush3.bf16.msra.mxu1 %v3583_v55  ;;  %v3589_v0 = vpack.c.bf16 %v2380_v47, %v2379_v36 }
 0x66d   :  { %3585 = vmatprep.subr.bf16.mxu1 %v3634_v46 }
 0x66f   :  { %3554 = vmatpush3.bf16.msra.mxu0 %v3553_v3 }
 0x670   :  { %3555 = vmatprep.subr.bf16.mxu0 %v3634_v46  ;;  %3587 = vmatpush3.bf16.msra.mxu1 %v3586_v60 }
 0x671   :  { %3588 = vmatprep.subr.bf16.mxu1 %v3634_v46 }
 0x673   :  { %3557 = vmatpush3.bf16.msra.mxu0 %v3556_v2 }
 0x674   :  { %3558 = vmatprep.subr.bf16.mxu0 %v3634_v46  ;;  %3590 = vmatpush3.bf16.msra.mxu1 %v3589_v0 }
 0x675   :  { %3591 = vmatprep.subr.bf16.mxu1 %v3634_v46 }
 0x677   :  { %3560 = vmatpush3.bf16.msra.mxu0 %v3559_v5 }
 0x678   :  { %3561 = vmatprep.subr.bf16.mxu0 %v3634_v46  ;;  %3593 = vmatpush3.bf16.msra.mxu1 %v3592_v50 }
 0x679   :  { %3594 = vmatprep.subr.bf16.mxu1 %v3634_v46 }
 0x67b   :  { %3563 = vmatpush3.bf16.msra.mxu0 %v3562_v58 }
 0x67c   :  { %3564 = vmatprep.subr.bf16.mxu0 %v3634_v46  ;;  %3596 = vmatpush3.bf16.msra.mxu1 %v3595_v16 }
 0x67f   :  { %3566 = vmatpush3.bf16.msra.mxu0 %v3565_v9 }
 0x680   :  { %3567 = vmatprep.subr.bf16.mxu0 %v3634_v46 }
 0x683   :  { %3569 = vmatpush3.bf16.msra.mxu0 %v3568_v11 }
 0x684   :  { %3570 = vmatprep.subr.bf16.mxu0 %v3634_v46 }
 0x687   :  { %3572 = vmatpush3.bf16.msra.mxu0 %v3571_v14 }
 0x72d   :  { %v1834_v46 = vpop.f32.mrb[18].mxu0  ;;  %v1985_v17 = vpop.f32.mrb[24].mxu1 }
 0x72e   :  { %v3032_v18 = vpop.f32.mrb[19].mxu0  ;;  %v3054_v19 = vpop.f32.mrb[25].mxu1 }
 0x731   :  { %v2144_v20 = vpop.f32.mrb[26].mxu1 }
 0x732   :  { %v3072_v21 = vpop.f32.mrb[27].mxu1  ;;  %3106 = vmatmul.mubr.f32.vlgmr.msra.gmra.mrb[24].mxu0 %v2144_v20  ;;  %3141 = vmatmul.mubr.f32.vlgmr.msra.gmra.mrb[28].mxu1 %v2144_v20 }
 0x735   :  { %v1909_v22 = vpop.f32.mrb[20].mxu0 }
 0x736   :  { %v1913_v26 = vmax.f32 %v1834_v46, %v1909_v22  ;;  %v3043_v27 = vpop.f32.mrb[21].mxu0 }
 0x73d   :  { %v2060_v28 = vpop.f32.mrb[22].mxu0 }
 0x73e   :  { %v2064_v29 = vmax.f32 %v1985_v17, %v2060_v28  ;;  %v3065_v30 = vpop.f32.mrb[23].mxu0 }
 0x740   :  { %v2065_v31 = vmax.f32 %v1913_v26, %v2064_v29 }
 0x742   :  { %2067 = vst.msk [vmem:[%s4219_s17] sm:$0xf] %vm2066_vm11, %v2065_v31 }
 0x805   :  { %v2230_v32 = vpop.f32.mrb[24].mxu0  ;;  %v2317_v33 = vpop.f32.mrb[28].mxu1 }
 0x806   :  { %v2321_v34 = vmax.f32 %v2230_v32, %v2317_v33  ;;  %v3107_v35 = vpop.f32.mrb[25].mxu0  ;;  %v3142_v37 = vpop.f32.mrb[29].mxu1 }
 0x808   :  { %2322 = vst.msk [vmem:[%s4220_s18] sm:$0xff] %vm348_vm4, %v2321_v34 }
 0x809   :  { %2331 = vsyncpa [#allocation4], 1 }

</bundles_post_ra>
